<compile_context>
chip_gen: v6e
topology: v6e:2x2x1
jax: 0.10.0
libtpu: 0.0.40
codegen_flags: <defaults>
</compile_context>

<pallas_src>
import jax
import jax.numpy as jnp
from jax.experimental import pallas as pl
from jax.experimental.pallas import tpu as pltpu

_F32 = jnp.float32
_VMEM = pl.BlockSpec(memory_space=pltpu.MemorySpace.VMEM)
_HPAD = 128          # padded LSTM hidden width == per-gate lane block (one vreg)
_BLK = 64            # per-modality hidden block width inside the fused SubNet


def _ru8(n):
    return ((n + 7) // 8) * 8


# ----------------------------------------------------------------------------
# Fused kernel: SubNet(audio)+SubNet(video) (block-diag) + LSTM TextSubNet + LMF
# ----------------------------------------------------------------------------
def _lmf_fused_kernel(avx_ref, txt_ref, pA_ref, pL_ref, pF_ref, o_ref):
    B, AVIN = avx_ref.shape
    SBP, TIN = txt_ref.shape
    BP = _ru8(B)                     # batch rows per timestep block (sublane tile)
    S = SBP // BP
    LW = pA_ref.shape[1]             # fused SubNet layer width (2 * _BLK)
    G4 = pL_ref.shape[1]             # 4 gate blocks
    GW = G4 // 4                     # per-gate lane block
    rb = _ru8(TIN)
    HPAD = pL_ref.shape[0] - rb - 8  # padded hidden width (rows of Whh)
    RD = pF_ref.shape[1]             # rank * output_dim
    OUT = o_ref.shape[1]
    R = RD // OUT
    assert GW == HPAD, "gate block width must equal padded hidden width"

    # ---- fused audio+video SubNet: block-diagonal weights, BN folded into L1,
    #      dropout = identity (eval). One matmul per layer for both modalities.
    r1 = _ru8(AVIN)
    y = jnp.maximum(
        jnp.dot(avx_ref[...], pA_ref[0:AVIN, :], preferred_element_type=_F32)
        + pA_ref[r1:r1 + 1, :], 0.0)
    y = jnp.maximum(
        jnp.dot(y, pA_ref[r1 + 8:r1 + 8 + LW, :], preferred_element_type=_F32)
        + pA_ref[r1 + 8 + LW:r1 + 9 + LW, :], 0.0)
    y = jnp.maximum(
        jnp.dot(y, pA_ref[r1 + 16 + LW:r1 + 16 + 2 * LW, :],
                preferred_element_type=_F32)
        + pA_ref[r1 + 16 + 2 * LW:r1 + 17 + 2 * LW, :], 0.0)
    # y: (B, LW); audio_h lives in lanes [0, a_hid), video_h in [BLK, BLK+v_hid).

    # ---- Text LSTM (single layer). Gates packed in 128-lane blocks [i|f|g|o]:
    #      ONE input-projection matmul for all timesteps, ONE h@Whh per step.
    wih = pL_ref[0:TIN, :]                        # (TIN, 4*GW)
    bih = pL_ref[rb:rb + 1, :]                    # (1, 4*GW)   (b_ih + b_hh)
    whh = pL_ref[rb + 8:rb + 8 + HPAD, :]         # (HPAD, 4*GW)
    xp = jnp.dot(txt_ref[...], wih, preferred_element_type=_F32) + bih   # (S*BP, 4*GW)

    h = jnp.zeros((BP, HPAD), _F32)
    c = jnp.zeros((BP, HPAD), _F32)
    for t in range(S):                            # fully unrolled (S small, static)
        pre = xp[t * BP:(t + 1) * BP, :] + jnp.dot(h, whh,
                                                   preferred_element_type=_F32)
        i_g = jax.nn.sigmoid(pre[:, 0:GW])
        f_g = jax.nn.sigmoid(pre[:, GW:2 * GW])
        g_g = jnp.tanh(pre[:, 2 * GW:3 * GW])
        o_g = jax.nn.sigmoid(pre[:, 3 * GW:4 * GW])
        c = f_g * c + i_g * g_g
        h = o_g * jnp.tanh(c)
    h = h[0:B, :]                                 # drop padded batch rows (aligned)

    # ---- Low-rank fusion. TextSubNet output Linear + fusion_weights are folded
    #      into the factor slab host-side; bias rows are in an aligned 8-row block.
    afw = pF_ref[0:LW, :]
    vfw = pF_ref[LW:2 * LW, :]
    tfw = pF_ref[2 * LW:2 * LW + HPAD, :]
    bias = pF_ref[2 * LW + HPAD:2 * LW + HPAD + 8, :]      # (8, RD)
    fa = bias[0:1, :] + jnp.dot(y, afw, preferred_element_type=_F32)
    fv = bias[1:2, :] + jnp.dot(y, vfw, preferred_element_type=_F32)
    ft = bias[2:3, :] + jnp.dot(h, tfw, preferred_element_type=_F32)
    zy = fa * fv * ft                                      # (B, R*OUT)

    acc = zy[:, 0:OUT]
    for r in range(1, R):                                  # tiny static rank sum
        acc = acc + zy[:, r * OUT:(r + 1) * OUT]
    o_ref[...] = acc + bias[3:4, 0:OUT]


def lmf_forward(kparams, audio_x, video_x, text_x, *, out_dim, use_softmax=False):
    B, S, Tin = text_x.shape
    BP = _ru8(B)
    # Concat the two dense-modality inputs -> one operand, one layer-1 matmul.
    av_x = jnp.concatenate([audio_x, video_x], axis=1).astype(_F32)
    # Time-major text with batch rows padded to a full sublane tile per timestep
    # so per-step gate-input slabs in the kernel are sublane-aligned slices.
    t_tm = jnp.transpose(text_x, (1, 0, 2)).astype(_F32)           # (S, B, Tin)
    t_tm = jnp.pad(t_tm, ((0, 0), (0, BP - B), (0, 0)))
    text2d = t_tm.reshape(S * BP, Tin)

    pA, pL, pF = kparams["sub_slab"], kparams["lstm_slab"], kparams["fus_slab"]
    LW, G4, RD = pA.shape[1], pL.shape[1], pF.shape[1]
    flops = 2 * (B * av_x.shape[1] * LW + 2 * B * LW * LW          # subnets
                 + S * BP * Tin * G4 + S * BP * _HPAD * G4          # lstm
                 + 2 * B * LW * RD + B * _HPAD * RD)                # fusion
    trans = 5 * S * BP * (G4 // 4)
    bytes_accessed = 4 * (av_x.size + text2d.size + pA.size + pL.size + pF.size
                          + B * out_dim)

    out = pl.pallas_call(
        _lmf_fused_kernel,
        out_shape=jax.ShapeDtypeStruct((B, out_dim), _F32),
        in_specs=[_VMEM] * 5,
        out_specs=_VMEM,
        cost_estimate=pl.CostEstimate(flops=int(flops), transcendentals=int(trans),
                                      bytes_accessed=int(bytes_accessed)),
    )(av_x, text2d, pA, pL, pF)
    if use_softmax:
        out = jax.nn.softmax(out, axis=-1)
    return out


# ----------------------------------------------------------------------------
# Parameter construction (PyTorch-faithful shapes)
# ----------------------------------------------------------------------------
def _xavier_normal(key, shape):
    if len(shape) == 2:
        fan_in, fan_out = shape[1], shape[0]
    else:
        receptive = 1
        for d in shape[2:]:
            receptive *= d
        fan_in = shape[1] * receptive
        fan_out = shape[0] * receptive
    std = (2.0 / (fan_in + fan_out)) ** 0.5
    return std * jax.random.normal(key, shape, dtype=_F32)


def _linear_init(key, in_dim, out_dim):
    k1, k2 = jax.random.split(key)
    bound = 1.0 / (in_dim ** 0.5)
    w = jax.random.uniform(k1, (in_dim, out_dim), _F32, -bound, bound)
    b = jax.random.uniform(k2, (1, out_dim), _F32, -bound, bound)
    return w, b


def _make_subnet_params(key, in_size, hidden):
    k1, k2, k3 = jax.random.split(key, 3)
    w1, b1 = _linear_init(k1, in_size, hidden)
    w2, b2 = _linear_init(k2, hidden, hidden)
    w3, b3 = _linear_init(k3, hidden, hidden)
    return dict(
        gamma=jnp.ones((1, in_size), _F32), beta=jnp.zeros((1, in_size), _F32),
        mean=jnp.zeros((1, in_size), _F32), var=jnp.ones((1, in_size), _F32),
        w1=w1, b1=b1, w2=w2, b2=b2, w3=w3, b3=b3,
    )


def _make_textsubnet_params(key, in_size, hidden, out_size):
    k1, k2, k3, k4, k5 = jax.random.split(key, 5)
    bound = 1.0 / (hidden ** 0.5)
    wih = jax.random.uniform(k1, (in_size, 4 * hidden), _F32, -bound, bound)
    whh = jax.random.uniform(k2, (hidden, 4 * hidden), _F32, -bound, bound)
    b_ih = jax.random.uniform(k3, (1, 4 * hidden), _F32, -bound, bound)
    b_hh = jax.random.uniform(k4, (1, 4 * hidden), _F32, -bound, bound)
    wl, bl = _linear_init(k5, hidden, out_size)
    return dict(wih=wih, whh=whh, b=b_ih + b_hh, wl=wl, bl=bl)


def make_lmf_params(key, input_dims, hidden_dims, text_out, output_dim, rank):
    keys = jax.random.split(key, 7)
    audio_in, video_in, text_in = input_dims
    audio_hidden, video_hidden, text_hidden = hidden_dims
    return dict(
        audio_subnet=_make_subnet_params(keys[0], audio_in, audio_hidden),
        video_subnet=_make_subnet_params(keys[1], video_in, video_hidden),
        text_subnet=_make_textsubnet_params(keys[2], text_in, text_hidden, text_out),
        audio_factor=_xavier_normal(keys[3], (rank, audio_hidden + 1, output_dim)),
        video_factor=_xavier_normal(keys[4], (rank, video_hidden + 1, output_dim)),
        text_factor=_xavier_normal(keys[5], (rank, text_out + 1, output_dim)),
        fusion_weights=_xavier_normal(keys[6], (1, rank)),
        fusion_bias=jnp.zeros((1, output_dim), _F32),
    )


# ----------------------------------------------------------------------------
# One-time host-side repack of the PyTorch-faithful params into 3 kernel slabs
# ----------------------------------------------------------------------------
def prepare_kernel_params(raw):
    a, v, t = raw["audio_subnet"], raw["video_subnet"], raw["text_subnet"]
    a_in, a_hid = a["w1"].shape
    v_in, v_hid = v["w1"].shape
    t_in, four_h = t["wih"].shape
    t_hid = four_h // 4
    rank, _, out_dim = raw["audio_factor"].shape

    LW = 2 * _BLK
    GW = _HPAD
    assert a_hid <= _BLK and v_hid <= _BLK and t_hid <= GW

    def bn_fold(p):   # eval-mode BatchNorm -> affine (then folded into layer-1)
        scale = p["gamma"] * jax.lax.rsqrt(p["var"] + 1e-5)
        shift = p["beta"] - p["mean"] * scale
        return scale, shift

    a_sc, a_sh = bn_fold(a)
    v_sc, v_sh = bn_fold(v)

    # -------- subnet slab: block-diagonal audio/video weights, BN folded into L1
    avin = a_in + v_in
    w1 = jnp.zeros((avin, LW), _F32)
    w1 = w1.at[0:a_in, 0:a_hid].set(a["w1"] * a_sc.reshape(-1, 1))
    w1 = w1.at[a_in:avin, _BLK:_BLK + v_hid].set(v["w1"] * v_sc.reshape(-1, 1))
    b1 = jnp.zeros((1, LW), _F32)
    b1 = b1.at[:, 0:a_hid].set(a["b1"] + a_sh @ a["w1"])
    b1 = b1.at[:, _BLK:_BLK + v_hid].set(v["b1"] + v_sh @ v["w1"])

    def block_diag(wa, wv):
        w = jnp.zeros((LW, LW), _F32)
        w = w.at[0:wa.shape[0], 0:wa.shape[1]].set(wa)
        w = w.at[_BLK:_BLK + wv.shape[0], _BLK:_BLK + wv.shape[1]].set(wv)
        return w

    def block_bias(ba, bv):
        b = jnp.zeros((1, LW), _F32)
        b = b.at[:, 0:ba.shape[1]].set(ba)
        b = b.at[:, _BLK:_BLK + bv.shape[1]].set(bv)
        return b

    def rowpad(x, rows):
        return jnp.pad(x, ((0, rows - x.shape[0]), (0, 0)))

    sub_slab = jnp.concatenate([
        rowpad(w1, _ru8(avin)), rowpad(b1, 8),
        block_diag(a["w2"], v["w2"]), rowpad(block_bias(a["b2"], v["b2"]), 8),
        block_diag(a["w3"], v["w3"]), rowpad(block_bias(a["b3"], v["b3"]), 8),
    ], axis=0)

    # -------- LSTM slab: per-gate 128-lane blocks in PyTorch gate order [i|f|g|o]
    def pack_gates(w, rows_pad):
        out = jnp.zeros((rows_pad, 4 * GW), _F32)
        for g in range(4):
            out = out.at[0:w.shape[0], g * GW:g * GW + t_hid].set(
                w[:, g * t_hid:(g + 1) * t_hid])
        return out

    lstm_slab = jnp.concatenate([
        pack_gates(t["wih"], _ru8(t_in)),     # rows [0, ru8(t_in))
        pack_gates(t["b"], 8),                # bias row (b_ih + b_hh)
        pack_gates(t["whh"], _HPAD),          # (HPAD, 4*GW), rows [0, t_hid) valid
    ], axis=0)

    # -------- fusion slab: factors flattened to (h, rank*out_dim); fusion_weights
    #          folded into the audio factor; TextSubNet output Linear folded into
    #          the text factor; bias rows kept in one aligned 8-row block.
    def flat_factor(f, per_rank_w=None):
        if per_rank_w is not None:
            f = f * per_rank_w.reshape(-1, 1, 1)
        r, hp1, d = f.shape
        flat = jnp.transpose(f, (1, 0, 2)).reshape(hp1, r * d)
        return flat[0:1, :], flat[1:, :]      # (bias row, weight)

    af_b, af_w = flat_factor(raw["audio_factor"], raw["fusion_weights"][0])
    vf_b, vf_w = flat_factor(raw["video_factor"])
    tf_b, tf_w = flat_factor(raw["text_factor"])
    RD = rank * out_dim

    afw_full = jnp.zeros((LW, RD), _F32).at[0:a_hid, :].set(af_w)
    vfw_full = jnp.zeros((LW, RD), _F32).at[_BLK:_BLK + v_hid, :].set(vf_w)
    # ft = tf_b + (h @ wl + bl) @ tf_w  ==  (tf_b + bl @ tf_w) + h @ (wl @ tf_w)
    tfw_full = jnp.zeros((_HPAD, RD), _F32).at[0:t_hid, :].set(t["wl"] @ tf_w)
    bias_blk = jnp.zeros((8, RD), _F32)
    bias_blk = bias_blk.at[0:1, :].set(af_b)
    bias_blk = bias_blk.at[1:2, :].set(vf_b)
    bias_blk = bias_blk.at[2:3, :].set(tf_b + t["bl"] @ tf_w)
    bias_blk = bias_blk.at[3:4, 0:out_dim].set(raw["fusion_bias"])

    fus_slab = jnp.concatenate([afw_full, vfw_full, tfw_full, bias_blk], axis=0)

    return dict(sub_slab=sub_slab, lstm_slab=lstm_slab, fus_slab=fus_slab)


# ----------------------------------------------------------------------------
# Pure-JAX reference (mirrors the PyTorch module, eval mode)
# ----------------------------------------------------------------------------
def _lmf_reference(raw, audio_x, video_x, text_x):
    hp = jax.lax.Precision.HIGHEST

    def subnet(x, p):
        inv = jax.lax.rsqrt(p["var"] + 1e-5)
        normed = (x - p["mean"]) * inv * p["gamma"] + p["beta"]
        y = jnp.maximum(jnp.dot(normed, p["w1"], precision=hp) + p["b1"], 0.0)
        y = jnp.maximum(jnp.dot(y, p["w2"], precision=hp) + p["b2"], 0.0)
        y = jnp.maximum(jnp.dot(y, p["w3"], precision=hp) + p["b3"], 0.0)
        return y

    audio_h = subnet(audio_x, raw["audio_subnet"])
    video_h = subnet(video_x, raw["video_subnet"])

    tp = raw["text_subnet"]
    B, S, _ = text_x.shape
    H = tp["whh"].shape[0]
    h = jnp.zeros((B, H), _F32)
    c = jnp.zeros((B, H), _F32)
    for t in range(S):
        gates = (jnp.dot(text_x[:, t, :], tp["wih"], precision=hp)
                 + jnp.dot(h, tp["whh"], precision=hp) + tp["b"])
        i = jax.nn.sigmoid(gates[:, 0:H])
        f = jax.nn.sigmoid(gates[:, H:2 * H])
        g = jnp.tanh(gates[:, 2 * H:3 * H])
        o = jax.nn.sigmoid(gates[:, 3 * H:4 * H])
        c = f * c + i * g
        h = o * jnp.tanh(c)
    text_h = jnp.dot(h, tp["wl"], precision=hp) + tp["bl"]

    def fuse(hm, factor):
        ones = jnp.ones((hm.shape[0], 1), _F32)
        _h = jnp.concatenate([ones, hm], axis=1)
        return jnp.einsum("bh,rhd->rbd", _h, factor, precision=hp)

    zy = (fuse(audio_h, raw["audio_factor"])
          * fuse(video_h, raw["video_factor"])
          * fuse(text_h, raw["text_factor"]))
    out = jnp.einsum("r,rbd->bd", raw["fusion_weights"][0], zy,
                     precision=hp) + raw["fusion_bias"]
    return out


if __name__ == "__main__":
    batch = 4
    input_dims = (8, 16, 12)        # (audio_in, video_in, text_in)
    hidden_dims = (16, 16, 24)      # (audio_hidden, video_hidden, text_hidden)
    text_out = 16
    output_dim = 4
    rank = 4
    seq_len = 8

    key = jax.random.PRNGKey(0)
    k_params, k_a, k_v, k_t = jax.random.split(key, 4)
    raw_params = make_lmf_params(k_params, input_dims, hidden_dims, text_out,
                                 output_dim, rank)
    kparams = prepare_kernel_params(raw_params)

    audio_x = jax.random.normal(k_a, (batch, input_dims[0]), _F32)
    video_x = jax.random.normal(k_v, (batch, input_dims[1]), _F32)
    text_x = jax.random.normal(k_t, (batch, seq_len, input_dims[2]), _F32)

    fwd = jax.jit(lmf_forward, static_argnames=("out_dim", "use_softmax"))
    out = fwd(kparams, audio_x, video_x, text_x, out_dim=output_dim,
              use_softmax=False)
    out = jax.block_until_ready(out)

    ref = jax.block_until_ready(_lmf_reference(raw_params, audio_x, video_x, text_x))

    assert out.shape == (batch, output_dim)
    assert out.dtype == jnp.float32
    assert jnp.allclose(out, ref, atol=2e-3, rtol=1e-2), (out, ref)
    print("KERNEL_OK")
</pallas_src>

<mosaic_0001>
module attributes {stable_mosaic.version = 11 : i64} {
  func.func @_lmf_fused_kernel(%arg0: memref<4x24xf32, #tpu.memory_space<vmem>>, %arg1: memref<64x12xf32, #tpu.memory_space<vmem>>, %arg2: memref<304x128xf32, #tpu.memory_space<vmem>>, %arg3: memref<152x512xf32, #tpu.memory_space<vmem>>, %arg4: memref<392x16xf32, #tpu.memory_space<vmem>>, %arg5: memref<4x4xf32, #tpu.memory_space<vmem>>) attributes {dimension_semantics = [], scalar_prefetch = 0 : i64, scratch_operands = 0 : i64, tpu.core_type = #tpu.core_type<tc>} {
    %c0 = arith.constant 0 : index
    %c0_0 = arith.constant 0 : index
    %0 = vector.load %arg0[%c0, %c0_0] : memref<4x24xf32, #tpu.memory_space<vmem>>, vector<4x24xf32>
    %c0_1 = arith.constant 0 : index
    %c0_2 = arith.constant 0 : index
    %1 = vector.load %arg2[%c0_1, %c0_2] : memref<304x128xf32, #tpu.memory_space<vmem>>, vector<24x128xf32>
    %cst = arith.constant dense<0.000000e+00> : vector<4x128xf32>
    %2 = tpu.matmul %0, %1, %cst {dimension_numbers = #tpu.dot_dimension_numbers<[1], [0], [0], [1], [0, 0, 1, 1], [], []>} : vector<4x24xf32>, vector<24x128xf32>, vector<4x128xf32> -> vector<4x128xf32>
    %c24 = arith.constant 24 : index
    %c0_3 = arith.constant 0 : index
    %3 = vector.load %arg2[%c24, %c0_3] : memref<304x128xf32, #tpu.memory_space<vmem>>, vector<1x128xf32>
    %4 = vector.broadcast %3 : vector<1x128xf32> to vector<4x128xf32>
    %5 = arith.addf %2, %4 : vector<4x128xf32>
    %cst_4 = arith.constant 0.000000e+00 : f32
    %6 = vector.broadcast %cst_4 : f32 to vector<4x128xf32>
    %7 = arith.maximumf %5, %6 : vector<4x128xf32>
    %c32 = arith.constant 32 : index
    %c0_5 = arith.constant 0 : index
    %8 = vector.load %arg2[%c32, %c0_5] : memref<304x128xf32, #tpu.memory_space<vmem>>, vector<128x128xf32>
    %cst_6 = arith.constant dense<0.000000e+00> : vector<4x128xf32>
    %9 = tpu.matmul %7, %8, %cst_6 {dimension_numbers = #tpu.dot_dimension_numbers<[1], [0], [0], [1], [0, 0, 1, 1], [], []>} : vector<4x128xf32>, vector<128x128xf32>, vector<4x128xf32> -> vector<4x128xf32>
    %c160 = arith.constant 160 : index
    %c0_7 = arith.constant 0 : index
    %10 = vector.load %arg2[%c160, %c0_7] : memref<304x128xf32, #tpu.memory_space<vmem>>, vector<1x128xf32>
    %11 = vector.broadcast %10 : vector<1x128xf32> to vector<4x128xf32>
    %12 = arith.addf %9, %11 : vector<4x128xf32>
    %cst_8 = arith.constant 0.000000e+00 : f32
    %13 = vector.broadcast %cst_8 : f32 to vector<4x128xf32>
    %14 = arith.maximumf %12, %13 : vector<4x128xf32>
    %c168 = arith.constant 168 : index
    %c0_9 = arith.constant 0 : index
    %15 = vector.load %arg2[%c168, %c0_9] : memref<304x128xf32, #tpu.memory_space<vmem>>, vector<128x128xf32>
    %cst_10 = arith.constant dense<0.000000e+00> : vector<4x128xf32>
    %16 = tpu.matmul %14, %15, %cst_10 {dimension_numbers = #tpu.dot_dimension_numbers<[1], [0], [0], [1], [0, 0, 1, 1], [], []>} : vector<4x128xf32>, vector<128x128xf32>, vector<4x128xf32> -> vector<4x128xf32>
    %c296 = arith.constant 296 : index
    %c0_11 = arith.constant 0 : index
    %17 = vector.load %arg2[%c296, %c0_11] : memref<304x128xf32, #tpu.memory_space<vmem>>, vector<1x128xf32>
    %18 = vector.broadcast %17 : vector<1x128xf32> to vector<4x128xf32>
    %19 = arith.addf %16, %18 : vector<4x128xf32>
    %cst_12 = arith.constant 0.000000e+00 : f32
    %20 = vector.broadcast %cst_12 : f32 to vector<4x128xf32>
    %21 = arith.maximumf %19, %20 : vector<4x128xf32>
    %c0_13 = arith.constant 0 : index
    %c0_14 = arith.constant 0 : index
    %22 = vector.load %arg3[%c0_13, %c0_14] : memref<152x512xf32, #tpu.memory_space<vmem>>, vector<12x512xf32>
    %c16 = arith.constant 16 : index
    %c0_15 = arith.constant 0 : index
    %23 = vector.load %arg3[%c16, %c0_15] : memref<152x512xf32, #tpu.memory_space<vmem>>, vector<1x512xf32>
    %c24_16 = arith.constant 24 : index
    %c0_17 = arith.constant 0 : index
    %24 = vector.load %arg3[%c24_16, %c0_17] : memref<152x512xf32, #tpu.memory_space<vmem>>, vector<128x512xf32>
    %c0_18 = arith.constant 0 : index
    %c0_19 = arith.constant 0 : index
    %25 = vector.load %arg1[%c0_18, %c0_19] : memref<64x12xf32, #tpu.memory_space<vmem>>, vector<64x12xf32>
    %cst_20 = arith.constant dense<0.000000e+00> : vector<64x512xf32>
    %26 = tpu.matmul %25, %22, %cst_20 {dimension_numbers = #tpu.dot_dimension_numbers<[1], [0], [0], [1], [0, 0, 1, 1], [], []>} : vector<64x12xf32>, vector<12x512xf32>, vector<64x512xf32> -> vector<64x512xf32>
    %27 = vector.broadcast %23 : vector<1x512xf32> to vector<64x512xf32>
    %28 = arith.addf %26, %27 : vector<64x512xf32>
    %cst_21 = arith.constant 0.000000e+00 : f32
    %29 = vector.broadcast %cst_21 : f32 to vector<8x128xf32>
    %cst_22 = arith.constant 0.000000e+00 : f32
    %30 = vector.broadcast %cst_22 : f32 to vector<8x128xf32>
    %31 = vector.extract_strided_slice %28 {offsets = [0, 0], sizes = [8, 512], strides = [1, 1]} : vector<64x512xf32> to vector<8x512xf32>
    %cst_23 = arith.constant dense<0.000000e+00> : vector<8x512xf32>
    %32 = tpu.matmul %29, %24, %cst_23 {dimension_numbers = #tpu.dot_dimension_numbers<[1], [0], [0], [1], [0, 0, 1, 1], [], []>} : vector<8x128xf32>, vector<128x512xf32>, vector<8x512xf32> -> vector<8x512xf32>
    %33 = arith.addf %31, %32 : vector<8x512xf32>
    %34 = vector.extract_strided_slice %33 {offsets = [0, 0], sizes = [8, 128], strides = [1, 1]} : vector<8x512xf32> to vector<8x128xf32>
    %35 = arith.negf %34 : vector<8x128xf32>
    %36 = math.exp %35 : vector<8x128xf32>
    %cst_24 = arith.constant 1.000000e+00 : f32
    %37 = vector.broadcast %cst_24 : f32 to vector<8x128xf32>
    %38 = arith.addf %37, %36 : vector<8x128xf32>
    %39 = arith.divf %37, %38 : vector<8x128xf32>
    %40 = vector.extract_strided_slice %33 {offsets = [0, 128], sizes = [8, 128], strides = [1, 1]} : vector<8x512xf32> to vector<8x128xf32>
    %41 = arith.negf %40 : vector<8x128xf32>
    %42 = math.exp %41 : vector<8x128xf32>
    %cst_25 = arith.constant 1.000000e+00 : f32
    %43 = vector.broadcast %cst_25 : f32 to vector<8x128xf32>
    %44 = arith.addf %43, %42 : vector<8x128xf32>
    %45 = arith.divf %43, %44 : vector<8x128xf32>
    %46 = vector.extract_strided_slice %33 {offsets = [0, 256], sizes = [8, 128], strides = [1, 1]} : vector<8x512xf32> to vector<8x128xf32>
    %47 = math.tanh %46 : vector<8x128xf32>
    %48 = vector.extract_strided_slice %33 {offsets = [0, 384], sizes = [8, 128], strides = [1, 1]} : vector<8x512xf32> to vector<8x128xf32>
    %49 = arith.negf %48 : vector<8x128xf32>
    %50 = math.exp %49 : vector<8x128xf32>
    %cst_26 = arith.constant 1.000000e+00 : f32
    %51 = vector.broadcast %cst_26 : f32 to vector<8x128xf32>
    %52 = arith.addf %51, %50 : vector<8x128xf32>
    %53 = arith.divf %51, %52 : vector<8x128xf32>
    %54 = arith.mulf %45, %30 : vector<8x128xf32>
    %55 = arith.mulf %39, %47 : vector<8x128xf32>
    %56 = arith.addf %54, %55 : vector<8x128xf32>
    %57 = math.tanh %56 : vector<8x128xf32>
    %58 = arith.mulf %53, %57 : vector<8x128xf32>
    %59 = vector.extract_strided_slice %28 {offsets = [8, 0], sizes = [8, 512], strides = [1, 1]} : vector<64x512xf32> to vector<8x512xf32>
    %cst_27 = arith.constant dense<0.000000e+00> : vector<8x512xf32>
    %60 = tpu.matmul %58, %24, %cst_27 {dimension_numbers = #tpu.dot_dimension_numbers<[1], [0], [0], [1], [0, 0, 1, 1], [], []>} : vector<8x128xf32>, vector<128x512xf32>, vector<8x512xf32> -> vector<8x512xf32>
    %61 = arith.addf %59, %60 : vector<8x512xf32>
    %62 = vector.extract_strided_slice %61 {offsets = [0, 0], sizes = [8, 128], strides = [1, 1]} : vector<8x512xf32> to vector<8x128xf32>
    %63 = arith.negf %62 : vector<8x128xf32>
    %64 = math.exp %63 : vector<8x128xf32>
    %cst_28 = arith.constant 1.000000e+00 : f32
    %65 = vector.broadcast %cst_28 : f32 to vector<8x128xf32>
    %66 = arith.addf %65, %64 : vector<8x128xf32>
    %67 = arith.divf %65, %66 : vector<8x128xf32>
    %68 = vector.extract_strided_slice %61 {offsets = [0, 128], sizes = [8, 128], strides = [1, 1]} : vector<8x512xf32> to vector<8x128xf32>
    %69 = arith.negf %68 : vector<8x128xf32>
    %70 = math.exp %69 : vector<8x128xf32>
    %cst_29 = arith.constant 1.000000e+00 : f32
    %71 = vector.broadcast %cst_29 : f32 to vector<8x128xf32>
    %72 = arith.addf %71, %70 : vector<8x128xf32>
    %73 = arith.divf %71, %72 : vector<8x128xf32>
    %74 = vector.extract_strided_slice %61 {offsets = [0, 256], sizes = [8, 128], strides = [1, 1]} : vector<8x512xf32> to vector<8x128xf32>
    %75 = math.tanh %74 : vector<8x128xf32>
    %76 = vector.extract_strided_slice %61 {offsets = [0, 384], sizes = [8, 128], strides = [1, 1]} : vector<8x512xf32> to vector<8x128xf32>
    %77 = arith.negf %76 : vector<8x128xf32>
    %78 = math.exp %77 : vector<8x128xf32>
    %cst_30 = arith.constant 1.000000e+00 : f32
    %79 = vector.broadcast %cst_30 : f32 to vector<8x128xf32>
    %80 = arith.addf %79, %78 : vector<8x128xf32>
    %81 = arith.divf %79, %80 : vector<8x128xf32>
    %82 = arith.mulf %73, %56 : vector<8x128xf32>
    %83 = arith.mulf %67, %75 : vector<8x128xf32>
    %84 = arith.addf %82, %83 : vector<8x128xf32>
    %85 = math.tanh %84 : vector<8x128xf32>
    %86 = arith.mulf %81, %85 : vector<8x128xf32>
    %87 = vector.extract_strided_slice %28 {offsets = [16, 0], sizes = [8, 512], strides = [1, 1]} : vector<64x512xf32> to vector<8x512xf32>
    %cst_31 = arith.constant dense<0.000000e+00> : vector<8x512xf32>
    %88 = tpu.matmul %86, %24, %cst_31 {dimension_numbers = #tpu.dot_dimension_numbers<[1], [0], [0], [1], [0, 0, 1, 1], [], []>} : vector<8x128xf32>, vector<128x512xf32>, vector<8x512xf32> -> vector<8x512xf32>
    %89 = arith.addf %87, %88 : vector<8x512xf32>
    %90 = vector.extract_strided_slice %89 {offsets = [0, 0], sizes = [8, 128], strides = [1, 1]} : vector<8x512xf32> to vector<8x128xf32>
    %91 = arith.negf %90 : vector<8x128xf32>
    %92 = math.exp %91 : vector<8x128xf32>
    %cst_32 = arith.constant 1.000000e+00 : f32
    %93 = vector.broadcast %cst_32 : f32 to vector<8x128xf32>
    %94 = arith.addf %93, %92 : vector<8x128xf32>
    %95 = arith.divf %93, %94 : vector<8x128xf32>
    %96 = vector.extract_strided_slice %89 {offsets = [0, 128], sizes = [8, 128], strides = [1, 1]} : vector<8x512xf32> to vector<8x128xf32>
    %97 = arith.negf %96 : vector<8x128xf32>
    %98 = math.exp %97 : vector<8x128xf32>
    %cst_33 = arith.constant 1.000000e+00 : f32
    %99 = vector.broadcast %cst_33 : f32 to vector<8x128xf32>
    %100 = arith.addf %99, %98 : vector<8x128xf32>
    %101 = arith.divf %99, %100 : vector<8x128xf32>
    %102 = vector.extract_strided_slice %89 {offsets = [0, 256], sizes = [8, 128], strides = [1, 1]} : vector<8x512xf32> to vector<8x128xf32>
    %103 = math.tanh %102 : vector<8x128xf32>
    %104 = vector.extract_strided_slice %89 {offsets = [0, 384], sizes = [8, 128], strides = [1, 1]} : vector<8x512xf32> to vector<8x128xf32>
    %105 = arith.negf %104 : vector<8x128xf32>
    %106 = math.exp %105 : vector<8x128xf32>
    %cst_34 = arith.constant 1.000000e+00 : f32
    %107 = vector.broadcast %cst_34 : f32 to vector<8x128xf32>
    %108 = arith.addf %107, %106 : vector<8x128xf32>
    %109 = arith.divf %107, %108 : vector<8x128xf32>
    %110 = arith.mulf %101, %84 : vector<8x128xf32>
    %111 = arith.mulf %95, %103 : vector<8x128xf32>
    %112 = arith.addf %110, %111 : vector<8x128xf32>
    %113 = math.tanh %112 : vector<8x128xf32>
    %114 = arith.mulf %109, %113 : vector<8x128xf32>
    %115 = vector.extract_strided_slice %28 {offsets = [24, 0], sizes = [8, 512], strides = [1, 1]} : vector<64x512xf32> to vector<8x512xf32>
    %cst_35 = arith.constant dense<0.000000e+00> : vector<8x512xf32>
    %116 = tpu.matmul %114, %24, %cst_35 {dimension_numbers = #tpu.dot_dimension_numbers<[1], [0], [0], [1], [0, 0, 1, 1], [], []>} : vector<8x128xf32>, vector<128x512xf32>, vector<8x512xf32> -> vector<8x512xf32>
    %117 = arith.addf %115, %116 : vector<8x512xf32>
    %118 = vector.extract_strided_slice %117 {offsets = [0, 0], sizes = [8, 128], strides = [1, 1]} : vector<8x512xf32> to vector<8x128xf32>
    %119 = arith.negf %118 : vector<8x128xf32>
    %120 = math.exp %119 : vector<8x128xf32>
    %cst_36 = arith.constant 1.000000e+00 : f32
    %121 = vector.broadcast %cst_36 : f32 to vector<8x128xf32>
    %122 = arith.addf %121, %120 : vector<8x128xf32>
    %123 = arith.divf %121, %122 : vector<8x128xf32>
    %124 = vector.extract_strided_slice %117 {offsets = [0, 128], sizes = [8, 128], strides = [1, 1]} : vector<8x512xf32> to vector<8x128xf32>
    %125 = arith.negf %124 : vector<8x128xf32>
    %126 = math.exp %125 : vector<8x128xf32>
    %cst_37 = arith.constant 1.000000e+00 : f32
    %127 = vector.broadcast %cst_37 : f32 to vector<8x128xf32>
    %128 = arith.addf %127, %126 : vector<8x128xf32>
    %129 = arith.divf %127, %128 : vector<8x128xf32>
    %130 = vector.extract_strided_slice %117 {offsets = [0, 256], sizes = [8, 128], strides = [1, 1]} : vector<8x512xf32> to vector<8x128xf32>
    %131 = math.tanh %130 : vector<8x128xf32>
    %132 = vector.extract_strided_slice %117 {offsets = [0, 384], sizes = [8, 128], strides = [1, 1]} : vector<8x512xf32> to vector<8x128xf32>
    %133 = arith.negf %132 : vector<8x128xf32>
    %134 = math.exp %133 : vector<8x128xf32>
    %cst_38 = arith.constant 1.000000e+00 : f32
    %135 = vector.broadcast %cst_38 : f32 to vector<8x128xf32>
    %136 = arith.addf %135, %134 : vector<8x128xf32>
    %137 = arith.divf %135, %136 : vector<8x128xf32>
    %138 = arith.mulf %129, %112 : vector<8x128xf32>
    %139 = arith.mulf %123, %131 : vector<8x128xf32>
    %140 = arith.addf %138, %139 : vector<8x128xf32>
    %141 = math.tanh %140 : vector<8x128xf32>
    %142 = arith.mulf %137, %141 : vector<8x128xf32>
    %143 = vector.extract_strided_slice %28 {offsets = [32, 0], sizes = [8, 512], strides = [1, 1]} : vector<64x512xf32> to vector<8x512xf32>
    %cst_39 = arith.constant dense<0.000000e+00> : vector<8x512xf32>
    %144 = tpu.matmul %142, %24, %cst_39 {dimension_numbers = #tpu.dot_dimension_numbers<[1], [0], [0], [1], [0, 0, 1, 1], [], []>} : vector<8x128xf32>, vector<128x512xf32>, vector<8x512xf32> -> vector<8x512xf32>
    %145 = arith.addf %143, %144 : vector<8x512xf32>
    %146 = vector.extract_strided_slice %145 {offsets = [0, 0], sizes = [8, 128], strides = [1, 1]} : vector<8x512xf32> to vector<8x128xf32>
    %147 = arith.negf %146 : vector<8x128xf32>
    %148 = math.exp %147 : vector<8x128xf32>
    %cst_40 = arith.constant 1.000000e+00 : f32
    %149 = vector.broadcast %cst_40 : f32 to vector<8x128xf32>
    %150 = arith.addf %149, %148 : vector<8x128xf32>
    %151 = arith.divf %149, %150 : vector<8x128xf32>
    %152 = vector.extract_strided_slice %145 {offsets = [0, 128], sizes = [8, 128], strides = [1, 1]} : vector<8x512xf32> to vector<8x128xf32>
    %153 = arith.negf %152 : vector<8x128xf32>
    %154 = math.exp %153 : vector<8x128xf32>
    %cst_41 = arith.constant 1.000000e+00 : f32
    %155 = vector.broadcast %cst_41 : f32 to vector<8x128xf32>
    %156 = arith.addf %155, %154 : vector<8x128xf32>
    %157 = arith.divf %155, %156 : vector<8x128xf32>
    %158 = vector.extract_strided_slice %145 {offsets = [0, 256], sizes = [8, 128], strides = [1, 1]} : vector<8x512xf32> to vector<8x128xf32>
    %159 = math.tanh %158 : vector<8x128xf32>
    %160 = vector.extract_strided_slice %145 {offsets = [0, 384], sizes = [8, 128], strides = [1, 1]} : vector<8x512xf32> to vector<8x128xf32>
    %161 = arith.negf %160 : vector<8x128xf32>
    %162 = math.exp %161 : vector<8x128xf32>
    %cst_42 = arith.constant 1.000000e+00 : f32
    %163 = vector.broadcast %cst_42 : f32 to vector<8x128xf32>
    %164 = arith.addf %163, %162 : vector<8x128xf32>
    %165 = arith.divf %163, %164 : vector<8x128xf32>
    %166 = arith.mulf %157, %140 : vector<8x128xf32>
    %167 = arith.mulf %151, %159 : vector<8x128xf32>
    %168 = arith.addf %166, %167 : vector<8x128xf32>
    %169 = math.tanh %168 : vector<8x128xf32>
    %170 = arith.mulf %165, %169 : vector<8x128xf32>
    %171 = vector.extract_strided_slice %28 {offsets = [40, 0], sizes = [8, 512], strides = [1, 1]} : vector<64x512xf32> to vector<8x512xf32>
    %cst_43 = arith.constant dense<0.000000e+00> : vector<8x512xf32>
    %172 = tpu.matmul %170, %24, %cst_43 {dimension_numbers = #tpu.dot_dimension_numbers<[1], [0], [0], [1], [0, 0, 1, 1], [], []>} : vector<8x128xf32>, vector<128x512xf32>, vector<8x512xf32> -> vector<8x512xf32>
    %173 = arith.addf %171, %172 : vector<8x512xf32>
    %174 = vector.extract_strided_slice %173 {offsets = [0, 0], sizes = [8, 128], strides = [1, 1]} : vector<8x512xf32> to vector<8x128xf32>
    %175 = arith.negf %174 : vector<8x128xf32>
    %176 = math.exp %175 : vector<8x128xf32>
    %cst_44 = arith.constant 1.000000e+00 : f32
    %177 = vector.broadcast %cst_44 : f32 to vector<8x128xf32>
    %178 = arith.addf %177, %176 : vector<8x128xf32>
    %179 = arith.divf %177, %178 : vector<8x128xf32>
    %180 = vector.extract_strided_slice %173 {offsets = [0, 128], sizes = [8, 128], strides = [1, 1]} : vector<8x512xf32> to vector<8x128xf32>
    %181 = arith.negf %180 : vector<8x128xf32>
    %182 = math.exp %181 : vector<8x128xf32>
    %cst_45 = arith.constant 1.000000e+00 : f32
    %183 = vector.broadcast %cst_45 : f32 to vector<8x128xf32>
    %184 = arith.addf %183, %182 : vector<8x128xf32>
    %185 = arith.divf %183, %184 : vector<8x128xf32>
    %186 = vector.extract_strided_slice %173 {offsets = [0, 256], sizes = [8, 128], strides = [1, 1]} : vector<8x512xf32> to vector<8x128xf32>
    %187 = math.tanh %186 : vector<8x128xf32>
    %188 = vector.extract_strided_slice %173 {offsets = [0, 384], sizes = [8, 128], strides = [1, 1]} : vector<8x512xf32> to vector<8x128xf32>
    %189 = arith.negf %188 : vector<8x128xf32>
    %190 = math.exp %189 : vector<8x128xf32>
    %cst_46 = arith.constant 1.000000e+00 : f32
    %191 = vector.broadcast %cst_46 : f32 to vector<8x128xf32>
    %192 = arith.addf %191, %190 : vector<8x128xf32>
    %193 = arith.divf %191, %192 : vector<8x128xf32>
    %194 = arith.mulf %185, %168 : vector<8x128xf32>
    %195 = arith.mulf %179, %187 : vector<8x128xf32>
    %196 = arith.addf %194, %195 : vector<8x128xf32>
    %197 = math.tanh %196 : vector<8x128xf32>
    %198 = arith.mulf %193, %197 : vector<8x128xf32>
    %199 = vector.extract_strided_slice %28 {offsets = [48, 0], sizes = [8, 512], strides = [1, 1]} : vector<64x512xf32> to vector<8x512xf32>
    %cst_47 = arith.constant dense<0.000000e+00> : vector<8x512xf32>
    %200 = tpu.matmul %198, %24, %cst_47 {dimension_numbers = #tpu.dot_dimension_numbers<[1], [0], [0], [1], [0, 0, 1, 1], [], []>} : vector<8x128xf32>, vector<128x512xf32>, vector<8x512xf32> -> vector<8x512xf32>
    %201 = arith.addf %199, %200 : vector<8x512xf32>
    %202 = vector.extract_strided_slice %201 {offsets = [0, 0], sizes = [8, 128], strides = [1, 1]} : vector<8x512xf32> to vector<8x128xf32>
    %203 = arith.negf %202 : vector<8x128xf32>
    %204 = math.exp %203 : vector<8x128xf32>
    %cst_48 = arith.constant 1.000000e+00 : f32
    %205 = vector.broadcast %cst_48 : f32 to vector<8x128xf32>
    %206 = arith.addf %205, %204 : vector<8x128xf32>
    %207 = arith.divf %205, %206 : vector<8x128xf32>
    %208 = vector.extract_strided_slice %201 {offsets = [0, 128], sizes = [8, 128], strides = [1, 1]} : vector<8x512xf32> to vector<8x128xf32>
    %209 = arith.negf %208 : vector<8x128xf32>
    %210 = math.exp %209 : vector<8x128xf32>
    %cst_49 = arith.constant 1.000000e+00 : f32
    %211 = vector.broadcast %cst_49 : f32 to vector<8x128xf32>
    %212 = arith.addf %211, %210 : vector<8x128xf32>
    %213 = arith.divf %211, %212 : vector<8x128xf32>
    %214 = vector.extract_strided_slice %201 {offsets = [0, 256], sizes = [8, 128], strides = [1, 1]} : vector<8x512xf32> to vector<8x128xf32>
    %215 = math.tanh %214 : vector<8x128xf32>
    %216 = vector.extract_strided_slice %201 {offsets = [0, 384], sizes = [8, 128], strides = [1, 1]} : vector<8x512xf32> to vector<8x128xf32>
    %217 = arith.negf %216 : vector<8x128xf32>
    %218 = math.exp %217 : vector<8x128xf32>
    %cst_50 = arith.constant 1.000000e+00 : f32
    %219 = vector.broadcast %cst_50 : f32 to vector<8x128xf32>
    %220 = arith.addf %219, %218 : vector<8x128xf32>
    %221 = arith.divf %219, %220 : vector<8x128xf32>
    %222 = arith.mulf %213, %196 : vector<8x128xf32>
    %223 = arith.mulf %207, %215 : vector<8x128xf32>
    %224 = arith.addf %222, %223 : vector<8x128xf32>
    %225 = math.tanh %224 : vector<8x128xf32>
    %226 = arith.mulf %221, %225 : vector<8x128xf32>
    %227 = vector.extract_strided_slice %28 {offsets = [56, 0], sizes = [8, 512], strides = [1, 1]} : vector<64x512xf32> to vector<8x512xf32>
    %cst_51 = arith.constant dense<0.000000e+00> : vector<8x512xf32>
    %228 = tpu.matmul %226, %24, %cst_51 {dimension_numbers = #tpu.dot_dimension_numbers<[1], [0], [0], [1], [0, 0, 1, 1], [], []>} : vector<8x128xf32>, vector<128x512xf32>, vector<8x512xf32> -> vector<8x512xf32>
    %229 = arith.addf %227, %228 : vector<8x512xf32>
    %230 = vector.extract_strided_slice %229 {offsets = [0, 0], sizes = [8, 128], strides = [1, 1]} : vector<8x512xf32> to vector<8x128xf32>
    %231 = arith.negf %230 : vector<8x128xf32>
    %232 = math.exp %231 : vector<8x128xf32>
    %cst_52 = arith.constant 1.000000e+00 : f32
    %233 = vector.broadcast %cst_52 : f32 to vector<8x128xf32>
    %234 = arith.addf %233, %232 : vector<8x128xf32>
    %235 = arith.divf %233, %234 : vector<8x128xf32>
    %236 = vector.extract_strided_slice %229 {offsets = [0, 128], sizes = [8, 128], strides = [1, 1]} : vector<8x512xf32> to vector<8x128xf32>
    %237 = arith.negf %236 : vector<8x128xf32>
    %238 = math.exp %237 : vector<8x128xf32>
    %cst_53 = arith.constant 1.000000e+00 : f32
    %239 = vector.broadcast %cst_53 : f32 to vector<8x128xf32>
    %240 = arith.addf %239, %238 : vector<8x128xf32>
    %241 = arith.divf %239, %240 : vector<8x128xf32>
    %242 = vector.extract_strided_slice %229 {offsets = [0, 256], sizes = [8, 128], strides = [1, 1]} : vector<8x512xf32> to vector<8x128xf32>
    %243 = math.tanh %242 : vector<8x128xf32>
    %244 = vector.extract_strided_slice %229 {offsets = [0, 384], sizes = [8, 128], strides = [1, 1]} : vector<8x512xf32> to vector<8x128xf32>
    %245 = arith.negf %244 : vector<8x128xf32>
    %246 = math.exp %245 : vector<8x128xf32>
    %cst_54 = arith.constant 1.000000e+00 : f32
    %247 = vector.broadcast %cst_54 : f32 to vector<8x128xf32>
    %248 = arith.addf %247, %246 : vector<8x128xf32>
    %249 = arith.divf %247, %248 : vector<8x128xf32>
    %250 = arith.mulf %241, %224 : vector<8x128xf32>
    %251 = arith.mulf %235, %243 : vector<8x128xf32>
    %252 = arith.addf %250, %251 : vector<8x128xf32>
    %253 = math.tanh %252 : vector<8x128xf32>
    %254 = arith.mulf %249, %253 : vector<8x128xf32>
    %255 = vector.extract_strided_slice %254 {offsets = [0, 0], sizes = [4, 128], strides = [1, 1]} : vector<8x128xf32> to vector<4x128xf32>
    %c0_55 = arith.constant 0 : index
    %c0_56 = arith.constant 0 : index
    %256 = vector.load %arg4[%c0_55, %c0_56] : memref<392x16xf32, #tpu.memory_space<vmem>>, vector<128x16xf32>
    %c128 = arith.constant 128 : index
    %c0_57 = arith.constant 0 : index
    %257 = vector.load %arg4[%c128, %c0_57] : memref<392x16xf32, #tpu.memory_space<vmem>>, vector<128x16xf32>
    %c256 = arith.constant 256 : index
    %c0_58 = arith.constant 0 : index
    %258 = vector.load %arg4[%c256, %c0_58] : memref<392x16xf32, #tpu.memory_space<vmem>>, vector<128x16xf32>
    %c384 = arith.constant 384 : index
    %c0_59 = arith.constant 0 : index
    %259 = vector.load %arg4[%c384, %c0_59] : memref<392x16xf32, #tpu.memory_space<vmem>>, vector<8x16xf32>
    %260 = vector.extract_strided_slice %259 {offsets = [0, 0], sizes = [1, 16], strides = [1, 1]} : vector<8x16xf32> to vector<1x16xf32>
    %cst_60 = arith.constant dense<0.000000e+00> : vector<4x16xf32>
    %261 = tpu.matmul %21, %256, %cst_60 {dimension_numbers = #tpu.dot_dimension_numbers<[1], [0], [0], [1], [0, 0, 1, 1], [], []>} : vector<4x128xf32>, vector<128x16xf32>, vector<4x16xf32> -> vector<4x16xf32>
    %262 = vector.broadcast %260 : vector<1x16xf32> to vector<4x16xf32>
    %263 = arith.addf %262, %261 : vector<4x16xf32>
    %264 = vector.extract_strided_slice %259 {offsets = [1, 0], sizes = [1, 16], strides = [1, 1]} : vector<8x16xf32> to vector<1x16xf32>
    %cst_61 = arith.constant dense<0.000000e+00> : vector<4x16xf32>
    %265 = tpu.matmul %21, %257, %cst_61 {dimension_numbers = #tpu.dot_dimension_numbers<[1], [0], [0], [1], [0, 0, 1, 1], [], []>} : vector<4x128xf32>, vector<128x16xf32>, vector<4x16xf32> -> vector<4x16xf32>
    %266 = vector.broadcast %264 : vector<1x16xf32> to vector<4x16xf32>
    %267 = arith.addf %266, %265 : vector<4x16xf32>
    %268 = vector.extract_strided_slice %259 {offsets = [2, 0], sizes = [1, 16], strides = [1, 1]} : vector<8x16xf32> to vector<1x16xf32>
    %cst_62 = arith.constant dense<0.000000e+00> : vector<4x16xf32>
    %269 = tpu.matmul %255, %258, %cst_62 {dimension_numbers = #tpu.dot_dimension_numbers<[1], [0], [0], [1], [0, 0, 1, 1], [], []>} : vector<4x128xf32>, vector<128x16xf32>, vector<4x16xf32> -> vector<4x16xf32>
    %270 = vector.broadcast %268 : vector<1x16xf32> to vector<4x16xf32>
    %271 = arith.addf %270, %269 : vector<4x16xf32>
    %272 = arith.mulf %263, %267 : vector<4x16xf32>
    %273 = arith.mulf %272, %271 : vector<4x16xf32>
    %274 = vector.extract_strided_slice %273 {offsets = [0, 0], sizes = [4, 4], strides = [1, 1]} : vector<4x16xf32> to vector<4x4xf32>
    %275 = vector.extract_strided_slice %273 {offsets = [0, 4], sizes = [4, 4], strides = [1, 1]} : vector<4x16xf32> to vector<4x4xf32>
    %276 = arith.addf %274, %275 : vector<4x4xf32>
    %277 = vector.extract_strided_slice %273 {offsets = [0, 8], sizes = [4, 4], strides = [1, 1]} : vector<4x16xf32> to vector<4x4xf32>
    %278 = arith.addf %276, %277 : vector<4x4xf32>
    %279 = vector.extract_strided_slice %273 {offsets = [0, 12], sizes = [4, 4], strides = [1, 1]} : vector<4x16xf32> to vector<4x4xf32>
    %280 = arith.addf %278, %279 : vector<4x4xf32>
    %281 = vector.extract_strided_slice %259 {offsets = [3, 0], sizes = [1, 4], strides = [1, 1]} : vector<8x16xf32> to vector<1x4xf32>
    %282 = vector.broadcast %281 : vector<1x4xf32> to vector<4x4xf32>
    %283 = arith.addf %280, %282 : vector<4x4xf32>
    %c0_63 = arith.constant 0 : index
    %c0_64 = arith.constant 0 : index
    %284 = vector.load %arg5[%c0_63, %c0_64] : memref<4x4xf32, #tpu.memory_space<vmem>>, vector<4x4xf32>
    tpu.vector_store %arg5[%c0_63, %c0_64], %283 {strides = array<i32>} : memref<4x4xf32, #tpu.memory_space<vmem>>, vector<4x4xf32>,
    return
  }
}

</mosaic_0001>

<bundles_post_ra>
// kernel: lmf_forward.1
= control target key start
LH: loop header
LB: loop body
LE: loop exit
PB: predicated region body
PF: predicated region fallthrough
CT: control target
= control target key end

     0   :  { %10 = vsyncpa [#allocation3], 0  ;;  %s4656_s0 = inlined_call_operand.vmem [shape: f32[4,24], index: 0, kind: input, shape index: {}]   ;;  %s4657_s1 = inlined_call_operand.vmem [shape: f32[64,12], index: 1, kind: input, shape index: {}]   ;;  %s4658_s2 = inlined_call_operand.hbm [shape: f32[304,128], index: 2, kind: input, shape index: {}]   ;;  %s4659_s3 = inlined_call_operand.vmem [shape: f32[152,512], index: 3, kind: input, shape index: {}]   ;;  %s4660_s4 = inlined_call_operand.vmem [shape: f32[392,16], index: 4, kind: input, shape index: {}]   ;;  %s4661_s5 = inlined_call_operand.hbm [shape: f32[4,4], index: 5, kind: output, shape index: {}]  }
   0x1   :  { %11 = vsyncpa [#allocation4], 0  ;;  %s2908_s18 = smov [#allocation2]  }
   0x2   :  { %s21_s19 = sshll.u32 %s2908_s18, 4  ;;  %s22_s19 = int_to_ptr.vmem [resolvable:$true] %s21_s19 }
   0x3   :  { %s2872_s20 = scalar_lea.vmem %s22_s19, 4864  ;;  %p2877_p1 = scmp.lt.s32.totalorder %s22_s19, %s22_s19 }
   0x4   :  { %p2873_p0 = scmp.ne.s32.totalorder %s22_s19, %s2872_s20  ;;  %p2878_p2 = scmp.lt.s32.totalorder %s2872_s20, %s2872_s20 }
   0x6   :  { %p2879_p3 = por %p2878_p2, %p2877_p1 }
   0x8   :  { %p2880_p4 = pnand %p2879_p3, %p2873_p0 }
   0xa   :  { %2883 = shalt.err (!%p2880_p4)
}
   0xb   :  { %s2909_s21 = smov 128   ;;  %s2910_s22 = smov 8  }
   0xc   :  { %27 = dma.hbm_to_vmem [thread:$0]  %s4658_s2, 4864, %s22_s19, [#allocation3], %s2909_s21, %s2909_s21, %s2910_s22  }
   0xd   :  { %2904 = dma.done.wait [#allocation3], 4864  }
   0xe   :  { %2905 = vsyncadd [#allocation3], 4294962432  ;;  %v4664_v0 = vmov 0.0   ;;  %vm2912_vm0 = vmmov 0   ;;  %v38_v1 = vld [vmem:[#allocation2 + $0x10] sm:$0xff]  ;;  %v37_v2 = vld [vmem:[#allocation2 + $0x8] sm:$0xff] }
   0xf   :  { %2479 = vmatprep.subr.mxu0 %v4664_v0  ;;  %2485 = vmatprep.mubr.msk.f32.mxu0 %vm2912_vm0, %v4664_v0  ;;  %v134_v3 = vld [vmem:[#allocation2 + $0x98] sm:$0xff]  ;;  %v133_v4 = vld [vmem:[#allocation2 + $0x90] sm:$0xff]  ;;  %v36_v5 = vld [vmem:[#allocation2] sm:$0xff]  ;;  %vm44_vm1 = vcmask 195584   ;;  %vm431_vm2 = vcmask 1043456   ;;  %vm406_vm3 = vcmask 97280  }
  0x10   :  { %2488 = vmatprep.subr.mxu1 %v4664_v0  ;;  %2520 = vmatprep.mubr.msk.f32.mxu1 %vm2912_vm0, %v4664_v0  ;;  %v35_v6 = vld [vmem:[%s4656_s0] sm:$0xf]  ;;  %v132_v7 = vld [vmem:[#allocation2 + $0x88] sm:$0xff]  ;;  %v130_v9 = vld [vmem:[#allocation2 + $0x78] sm:$0xff]  ;;  %s2914_s22 = smov 124   ;;  %s2915_s23 = smov 120  }
  0x11   :  { %2480 = vmatpush3.msra.mxu0 %v38_v1  ;;  %2489 = vmatpush3.msra.mxu1 %v134_v3  ;;  %v131_v8 = vld [vmem:[#allocation2 + $0x80] sm:$0xff]  ;;  %v129_v10 = vld [vmem:[#allocation2 + $0x70] sm:$0xff]  ;;  %v128_v11 = vld [vmem:[#allocation2 + $0x68] sm:$0xff]  ;;  %s2916_s24 = smov [#allocation5]   ;;  %vm2324_vm4 = vcmask 27648  }
  0x12   :  { %2481 = vmatprep.subr.mxu0 %v4664_v0  ;;  %2490 = vmatprep.subr.mxu1 %v4664_v0  ;;  %v127_v12 = vld [vmem:[#allocation2 + $0x60] sm:$0xff]  ;;  %v126_v13 = vld [vmem:[#allocation2 + $0x58] sm:$0xff]  ;;  %v125_v14 = vld [vmem:[#allocation2 + $0x50] sm:$0xff]  ;;  %s2332_s2 = sshll.u32 %s2916_s24, 4  ;;  %s2333_s2 = int_to_ptr.vmem [resolvable:$true] %s2332_s2 }
  0x13   :  { %2482 = vmatpush3.msra.mxu0 %v37_v2  ;;  %2491 = vmatpush3.msra.mxu1 %v133_v4  ;;  %v124_v15 = vld [vmem:[#allocation2 + $0x48] sm:$0xff]  ;;  %v123_v16 = vld [vmem:[#allocation2 + $0x40] sm:$0xff]  ;;  %v122_v17 = vld [vmem:[#allocation2 + $0x38] sm:$0xff]  ;;  %s2884_s25 = scalar_lea.vmem %s2333_s2, 64  ;;  %p2889_p6 = scmp.lt.s32.totalorder %s2333_s2, %s2333_s2 }
  0x14   :  { %2483 = vmatprep.subr.mxu0 %v4664_v0  ;;  %2492 = vmatprep.subr.mxu1 %v4664_v0  ;;  %v121_v18 = vld [vmem:[#allocation2 + $0x30] sm:$0xff]  ;;  %v120_v19 = vld [vmem:[#allocation2 + $0x28] sm:$0xff]  ;;  %v119_v20 = vld [vmem:[#allocation2 + $0x20] sm:$0xff]  ;;  %p2885_p5 = scmp.ne.s32.totalorder %s2333_s2, %s2884_s25  ;;  %p2890_p7 = scmp.lt.s32.totalorder %s2884_s25, %s2884_s25 }
  0x15   :  { %2484 = vmatpush3.msra.mxu0 %v36_v5  ;;  %2493 = vmatpush3.msra.mxu1 %v132_v7  ;;  %v308_v21 = vld [vmem:[%s4659_s3 + $0x28] sm:$0xf]  ;;  %v226_v22 = vld [vmem:[#allocation2 + $0x120] sm:$0xff]  ;;  %v225_v23 = vld [vmem:[#allocation2 + $0x118] sm:$0xff] }
  0x16   :  { %2486 = vmatmul.mubr.msk.f32.vlgmr.msra.gmra.mxu0 %vm44_vm1, %v35_v6  ;;  %2494 = vmatprep.subr.mxu1 %v4664_v0  ;;  %v224_v24 = vld [vmem:[#allocation2 + $0x110] sm:$0xff]  ;;  %v223_v25 = vld [vmem:[#allocation2 + $0x108] sm:$0xff]  ;;  %v222_v26 = vld [vmem:[#allocation2 + $0x100] sm:$0xff]  ;;  %p2891_p8 = por %p2890_p7, %p2889_p6 }
  0x17   :  { %2523 = vmatprep.subr.mxu0 %v4664_v0  ;;  %2495 = vmatpush3.msra.mxu1 %v131_v8  ;;  %v221_v27 = vld [vmem:[#allocation2 + $0xf8] sm:$0xff]  ;;  %v220_v28 = vld [vmem:[#allocation2 + $0xf0] sm:$0xff]  ;;  %v219_v29 = vld [vmem:[#allocation2 + $0xe8] sm:$0xff] }
  0x18   :  { %2555 = vmatprep.mubr.msk.f32.mxu0 %vm2912_vm0, %v4664_v0  ;;  %2496 = vmatprep.subr.mxu1 %v4664_v0  ;;  %v218_v30 = vld [vmem:[#allocation2 + $0xe0] sm:$0xff]  ;;  %v217_v31 = vld [vmem:[#allocation2 + $0xd8] sm:$0xff]  ;;  %v216_v32 = vld [vmem:[#allocation2 + $0xd0] sm:$0xff]  ;;  %p2892_p9 = pnand %p2891_p8, %p2885_p5 }
  0x19   :  { %2497 = vmatpush3.msra.mxu1 %v130_v9  ;;  %2524 = vmatpush3.msra.mxu0 %v226_v22  ;;  %v215_v33 = vld [vmem:[#allocation2 + $0xc8] sm:$0xff]  ;;  %v214_v34 = vld [vmem:[#allocation2 + $0xc0] sm:$0xff]  ;;  %v213_v35 = vld [vmem:[#allocation2 + $0xb8] sm:$0xff] }
  0x1a   :  { %2498 = vmatprep.subr.mxu1 %v4664_v0  ;;  %2525 = vmatprep.subr.mxu0 %v4664_v0  ;;  %v2341_v36 = vld [vmem:[#allocation2 + $0x18] ss:$0 sm:$0xff]  ;;  %v307_v41 = vld [vmem:[%s4659_s3 + $0x20] sm:$0xf]  ;;  %v304_v42 = vld [vmem:[%s4659_s3 + $0x8] sm:$0xff] }
  0x1b   :  { %2499 = vmatpush3.msra.mxu1 %v129_v10  ;;  %2526 = vmatpush3.msra.mxu0 %v225_v23  ;;  %v303_v43 = vld [vmem:[%s4659_s3] sm:$0xff]  ;;  %v3016_v45 = vld [vmem:[%s4659_s3 + $0x248] sm:$0xff]  ;;  %v3073_v54 = vld [vmem:[%s4657_s1 + $0x10] sm:$0xff] }
  0x1c   :  { %2500 = vmatprep.subr.mxu1 %v4664_v0  ;;  %2527 = vmatprep.subr.mxu0 %v4664_v0  ;;  %v3011_v44 = vld [vmem:[%s4657_s1] sm:$0xff]  ;;  %4749 = vst [vmem:[#allocation8_spill] sm:$0xff] %v3016_v45  ;;  %v3026_v47 = vld [vmem:[%s4659_s3 + $0x228] sm:$0xff]  ;;  %v3105_v59 = vld [vmem:[%s4657_s1 + $0x18] sm:$0xff] }
  0x1d   :  { %2501 = vmatpush3.msra.mxu1 %v128_v11  ;;  %2528 = vmatpush3.msra.mxu0 %v224_v24  ;;  %v3021_v46 = vld [vmem:[%s4659_s3 + $0x240] sm:$0xff]  ;;  %v3041_v49 = vld [vmem:[%s4657_s1 + $0x8] sm:$0xff]  ;;  %v3201_v11 = vld [vmem:[%s4657_s1 + $0x30] sm:$0xff]  ;;  %v386_v24 = vlaneseq }
  0x1e   :  { %2502 = vmatprep.subr.mxu1 %v4664_v0  ;;  %2529 = vmatprep.subr.mxu0 %v4664_v0  ;;  %v3034_v48 = vld [vmem:[%s4659_s3 + $0x220] sm:$0xff]  ;;  %v3046_v50 = vld [vmem:[%s4659_s3 + $0x208] sm:$0xff]  ;;  %v310_v23 = vld [vmem:[%s4659_s3 + $0x38] sm:$0xf] }
  0x1f   :  { %2503 = vmatpush3.msra.mxu1 %v127_v12  ;;  %2530 = vmatpush3.msra.mxu0 %v223_v25  ;;  %v3052_v51 = vld [vmem:[%s4659_s3 + $0x200] sm:$0xff]  ;;  %v3058_v52 = vld [vmem:[%s4659_s3 + $0x1e8] sm:$0xff] }
  0x20   :  { %2504 = vmatprep.subr.mxu1 %v4664_v0  ;;  %2531 = vmatprep.subr.mxu0 %v4664_v0  ;;  %v3066_v53 = vld [vmem:[%s4659_s3 + $0x1e0] sm:$0xff]  ;;  %v3078_v55 = vld [vmem:[%s4659_s3 + $0x1c8] sm:$0xff] }
  0x21   :  { %2505 = vmatpush3.msra.mxu1 %v126_v13  ;;  %2532 = vmatpush3.msra.mxu0 %v222_v26  ;;  %v3084_v56 = vld [vmem:[%s4659_s3 + $0x1c0] sm:$0xff]  ;;  %v3090_v57 = vld [vmem:[%s4659_s3 + $0x1a8] sm:$0xff]  ;;  %v3304_v26 = vshrl.u32 %v386_v24, 7 }
  0x22   :  { %2506 = vmatprep.subr.mxu1 %v4664_v0  ;;  %2533 = vmatprep.subr.mxu0 %v4664_v0  ;;  %v3098_v58 = vld [vmem:[%s4659_s3 + $0x1a0] sm:$0xff]  ;;  %v3110_v60 = vld [vmem:[%s4659_s3 + $0x188] sm:$0xff] }
  0x23   :  { %2507 = vmatpush3.msra.mxu1 %v125_v14  ;;  %2534 = vmatpush3.msra.mxu0 %v221_v27  ;;  %v3116_v61 = vld [vmem:[%s4659_s3 + $0x180] sm:$0xff]  ;;  %v3122_v62 = vld [vmem:[%s4659_s3 + $0x168] sm:$0xff]  ;;  %4761 = vst [vmem:[#allocation20_spill] sm:$0xff] %v3304_v26 }
  0x24   :  { %2508 = vmatprep.subr.mxu1 %v4664_v0  ;;  %2535 = vmatprep.subr.mxu0 %v4664_v0  ;;  %v3130_v63 = vld [vmem:[%s4659_s3 + $0x160] sm:$0xff]  ;;  %v3142_v2 = vld [vmem:[%s4659_s3 + $0x148] sm:$0xff] }
  0x25   :  { %2509 = vmatpush3.msra.mxu1 %v124_v15  ;;  %2536 = vmatpush3.msra.mxu0 %v220_v28  ;;  %v3137_v1 = vld [vmem:[%s4657_s1 + $0x20] sm:$0xff]  ;;  %v3154_v4 = vld [vmem:[%s4659_s3 + $0x128] sm:$0xff] }
  0x26   :  { %2510 = vmatprep.subr.mxu1 %v4664_v0  ;;  %2537 = vmatprep.subr.mxu0 %v4664_v0  ;;  %v3148_v3 = vld [vmem:[%s4659_s3 + $0x140] sm:$0xff]  ;;  %v3169_v6 = vld [vmem:[%s4657_s1 + $0x28] sm:$0xff] }
  0x27   :  { %2511 = vmatpush3.msra.mxu1 %v123_v16  ;;  %2538 = vmatpush3.msra.mxu0 %v219_v29  ;;  %v3162_v5 = vld [vmem:[%s4659_s3 + $0x120] sm:$0xff]  ;;  %v3174_v7 = vld [vmem:[%s4659_s3 + $0x108] sm:$0xff]  ;;  %v3233_v16 = vld [vmem:[%s4657_s1 + $0x38] sm:$0xff] }
  0x28   :  { %2512 = vmatprep.subr.mxu1 %v4664_v0  ;;  %2539 = vmatprep.subr.mxu0 %v4664_v0  ;;  %v3180_v8 = vld [vmem:[%s4659_s3 + $0x100] sm:$0xff]  ;;  %v3186_v9 = vld [vmem:[%s4659_s3 + $0xe8] sm:$0xff] }
  0x29   :  { %2513 = vmatpush3.msra.mxu1 %v122_v17  ;;  %2540 = vmatpush3.msra.mxu0 %v218_v30  ;;  %4750 = vst [vmem:[#allocation9_spill] sm:$0xff] %v3180_v8  ;;  %4751 = vst [vmem:[#allocation10_spill] sm:$0xff] %v3186_v9  ;;  %v3194_v10 = vld [vmem:[%s4659_s3 + $0xe0] sm:$0xff]  ;;  %v3206_v12 = vld [vmem:[%s4659_s3 + $0xc8] sm:$0xff] }
  0x2a   :  { %2514 = vmatprep.subr.mxu1 %v4664_v0  ;;  %2541 = vmatprep.subr.mxu0 %v4664_v0  ;;  %4752 = vst [vmem:[#allocation11_spill] sm:$0xff] %v3194_v10  ;;  %4753 = vst [vmem:[#allocation12_spill] sm:$0xff] %v3206_v12  ;;  %v3212_v13 = vld [vmem:[%s4659_s3 + $0xc0] sm:$0xff]  ;;  %v3218_v14 = vld [vmem:[%s4659_s3 + $0xa8] sm:$0xff] }
  0x2b   :  { %2515 = vmatpush3.msra.mxu1 %v121_v18  ;;  %2542 = vmatpush3.msra.mxu0 %v217_v31  ;;  %4754 = vst [vmem:[#allocation13_spill] sm:$0xff] %v3212_v13  ;;  %4755 = vst [vmem:[#allocation14_spill] sm:$0xff] %v3218_v14  ;;  %v3226_v15 = vld [vmem:[%s4659_s3 + $0xa0] sm:$0xff]  ;;  %v3238_v17 = vld [vmem:[%s4659_s3 + $0x88] sm:$0xff] }
  0x2c   :  { %2516 = vmatprep.subr.mxu1 %v4664_v0  ;;  %2543 = vmatprep.subr.mxu0 %v4664_v0  ;;  %4756 = vst [vmem:[#allocation15_spill] sm:$0xff] %v3226_v15  ;;  %4757 = vst [vmem:[#allocation16_spill] sm:$0xff] %v3238_v17  ;;  %v3244_v18 = vld [vmem:[%s4659_s3 + $0x80] sm:$0xff]  ;;  %v211_v22 = vld [vmem:[#allocation2 + $0xa8] sm:$0xff] }
  0x2d   :  { %2517 = vmatpush3.msra.mxu1 %v120_v19  ;;  %2544 = vmatpush3.msra.mxu0 %v216_v32  ;;  %4758 = vst [vmem:[#allocation17_spill] sm:$0xff] %v3244_v18  ;;  %v3250_v19 = vld [vmem:[%s4659_s3 + $0x68] sm:$0xff]  ;;  %v2343_v25 = vld [vmem:[#allocation2 + $0xa0] ss:$0 sm:$0xff]  ;;  %v309_v31 = vld [vmem:[%s4659_s3 + $0x30] sm:$0xf] }
  0x2e   :  { %2518 = vmatprep.subr.mxu1 %v4664_v0  ;;  %2545 = vmatprep.subr.mxu0 %v4664_v0  ;;  %4759 = vst [vmem:[#allocation18_spill] sm:$0xff] %v3250_v19  ;;  %v4663_v32 = vsub.s32 0, %v3304_v26 }
  0x2f   :  { %2519 = vmatpush3.msra.mxu1 %v119_v20  ;;  %2546 = vmatpush3.msra.mxu0 %v215_v33  ;;  %v3258_v20 = vld [vmem:[%s4659_s3 + $0x60] sm:$0xff]  ;;  %v306_v33 = vld [vmem:[%s4659_s3 + $0x18] sm:$0xff] }
  0x30   :  { %2346 = vmatprep.subr.msk.mxu1 %vm431_vm2, %v308_v21  ;;  %2547 = vmatprep.subr.mxu0 %v4664_v0  ;;  %4760 = vst [vmem:[#allocation19_spill] sm:$0xff] %v3258_v20  ;;  %v212_v21 = vld [vmem:[#allocation2 + $0xb0] sm:$0xff] }
  0x31   :  { %2548 = vmatpush3.msra.mxu0 %v214_v34  ;;  %v3316_v34 = vld [vmem:[%s4659_s3 + $0x40] ss:$8 sm:$0xf] }
  0x32   :  { %2549 = vmatprep.subr.mxu0 %v4664_v0 }
  0x33   :  { %2550 = vmatpush3.msra.mxu0 %v213_v35 }
  0x34   :  { %2551 = vmatprep.subr.mxu0 %v4664_v0 }
  0x35   :  { %2552 = vmatpush3.msra.mxu0 %v212_v21  ;;  %v3354_v21 = vld [vmem:[%s4659_s3 + $0x230] sm:$0xff] }
  0x36   :  { %2553 = vmatprep.subr.mxu0 %v4664_v0 }
  0x37   :  { %2554 = vmatpush3.msra.mxu0 %v211_v22 }
  0x38   :  { %2356 = vmatprep.subr.msk.mxu0 %vm431_vm2, %v310_v23 }
  0xd6   :  { %v114_v37 = vpop.f32.mrf.mxu0 }
  0xd7   :  { %v115_v38 = vadd.f32 %v2341_v36, %v114_v37  ;;  %v305_v36 = vld [vmem:[%s4659_s3 + $0x10] sm:$0xff]  ;;  %v4662_v37 = vsub.s32 1, %v3304_v26 }
  0xd8   :  { %v2487_v39 = vpop.f32.mrf.mxu0 }
  0xd9   :  { %v118_v40 = vmax.f32 %v115_v38, 0.0  ;;  %v3329_v38 = vld [vmem:[%s4659_s3 + $0x258] sm:$0xff]  ;;  %v3359_v22 = vrot.slane %v3316_v34, %v4662_v37  ;;  %v3425_v37 = vld [vmem:[%s4659_s3 + $0x1b0] sm:$0xff] }
  0xda   :  { %4762 = vst [vmem:[#allocation21_spill] sm:$0xff] %v3329_v38 }
  0xdb   :  { %2521 = vmatmul.mubr.f32.vlgmr.msra.gmra.mxu1 %v118_v40  ;;  %v3336_v40 = vld [vmem:[%s4659_s3 + $0x250] sm:$0xff] }
  0xdc   :  { %2347 = vmatpush1.msk.msra.mxu1 %vm431_vm2, %v307_v41  ;;  %508 = vmatprep.mubr.f32.mxu1 %v4664_v0  ;;  %v3341_v41 = vrot.slane %v3316_v34, %v4663_v32  ;;  %v3435_v32 = vld [vmem:[%s4659_s3 + $0x198] sm:$0xff] }
  0xdd   :  { %474 = vmatprep.subr.mxu1 %v304_v42  ;;  %v3346_v42 = vld [vmem:[%s4659_s3 + $0x238] sm:$0xff] }
  0xde   :  { %475 = vmatpush1.msra.mxu1 %v303_v43 }
  0xdf   :  { %2348 = vmatmul.mubr.msk.f32.vlgmr.msra.gmra.mxu1 %vm406_vm3, %v3011_v44  ;;  %670 = vmatprep.subr.mxu1 %v3016_v45 }
  0xe0   :  { %671 = vmatpush1.msra.mxu1 %v3021_v46  ;;  %514 = vmatprep.mubr.f32.mxu1 %v4664_v0 }
  0xe1   :  { %672 = vmatprep.subr.mxu1 %v3026_v47 }
  0xe2   :  { %673 = vmatpush1.msra.mxu1 %v3034_v48 }
  0xe3   :  { %2349 = vmatmul.mubr.msk.f32.gmra.mxu1 %vm406_vm3, %v3041_v49  ;;  %674 = vmatprep.subr.mxu1 %v3046_v50 }
  0xe4   :  { %675 = vmatpush1.msra.mxu1 %v3052_v51  ;;  %520 = vmatprep.mubr.f32.mxu1 %v4664_v0 }
  0xe5   :  { %676 = vmatprep.subr.mxu1 %v3058_v52 }
  0xe6   :  { %677 = vmatpush1.msra.mxu1 %v3066_v53 }
  0xe7   :  { %2350 = vmatmul.mubr.msk.f32.gmra.mxu1 %vm406_vm3, %v3073_v54  ;;  %678 = vmatprep.subr.mxu1 %v3078_v55 }
  0xe8   :  { %679 = vmatpush1.msra.mxu1 %v3084_v56  ;;  %526 = vmatprep.mubr.f32.mxu1 %v4664_v0 }
  0xe9   :  { %680 = vmatprep.subr.mxu1 %v3090_v57 }
  0xea   :  { %681 = vmatpush1.msra.mxu1 %v3098_v58 }
  0xeb   :  { %2351 = vmatmul.mubr.msk.f32.gmra.mxu1 %vm406_vm3, %v3105_v59  ;;  %682 = vmatprep.subr.mxu1 %v3110_v60 }
  0xec   :  { %683 = vmatpush1.msra.mxu1 %v3116_v61  ;;  %532 = vmatprep.mubr.f32.mxu1 %v4664_v0 }
  0xed   :  { %684 = vmatprep.subr.mxu1 %v3122_v62 }
  0xee   :  { %685 = vmatpush1.msra.mxu1 %v3130_v63 }
  0xef   :  { %2352 = vmatmul.mubr.msk.f32.gmra.mxu1 %vm406_vm3, %v3137_v1  ;;  %686 = vmatprep.subr.mxu1 %v3142_v2 }
  0xf0   :  { %687 = vmatpush1.msra.mxu1 %v3148_v3  ;;  %538 = vmatprep.mubr.f32.mxu1 %v4664_v0 }
  0xf1   :  { %688 = vmatprep.subr.mxu1 %v3154_v4 }
  0xf2   :  { %689 = vmatpush1.msra.mxu1 %v3162_v5 }
  0xf3   :  { %2353 = vmatmul.mubr.msk.f32.gmra.mxu1 %vm406_vm3, %v3169_v6  ;;  %690 = vmatprep.subr.mxu1 %v3174_v7 }
  0xf4   :  { %691 = vmatpush1.msra.mxu1 %v3180_v8  ;;  %544 = vmatprep.mubr.f32.mxu1 %v4664_v0 }
  0xf5   :  { %692 = vmatprep.subr.mxu1 %v3186_v9 }
  0xf6   :  { %693 = vmatpush1.msra.mxu1 %v3194_v10 }
  0xf7   :  { %2354 = vmatmul.mubr.msk.f32.gmra.mxu1 %vm406_vm3, %v3201_v11  ;;  %694 = vmatprep.subr.mxu1 %v3206_v12 }
  0xf8   :  { %695 = vmatpush1.msra.mxu1 %v3212_v13  ;;  %550 = vmatprep.mubr.f32.mxu1 %v4664_v0 }
  0xf9   :  { %696 = vmatprep.subr.mxu1 %v3218_v14 }
  0xfa   :  { %697 = vmatpush1.msra.mxu1 %v3226_v15 }
  0xfb   :  { %2355 = vmatmul.mubr.msk.f32.gmra.mxu1 %vm406_vm3, %v3233_v16  ;;  %698 = vmatprep.subr.mxu1 %v3238_v17 }
  0xfc   :  { %699 = vmatpush1.msra.mxu1 %v3244_v18  ;;  %734 = vmatprep.mubr.f32.mxu1 %v4664_v0 }
  0xfd   :  { %700 = vmatprep.subr.mxu1 %v3250_v19 }
  0xfe   :  { %701 = vmatpush1.msra.mxu1 %v3258_v20 }
  0xff   :  { %735 = vmatmul.mubr.f32.vlgmr.msra.gmra.mxu1 %v4664_v0  ;;  %840 = vmatprep.subr.mxu1 %v3016_v45 }
 0x100   :  { %841 = vmatpush1.msra.mxu1 %v3021_v46  ;;  %904 = vmatprep.mubr.f32.mxu1 %v4664_v0 }
 0x101   :  { %842 = vmatprep.subr.mxu1 %v3026_v47 }
 0x102   :  { %843 = vmatpush1.msra.mxu1 %v3034_v48 }
 0x103   :  { %844 = vmatprep.subr.mxu1 %v3046_v50 }
 0x104   :  { %845 = vmatpush1.msra.mxu1 %v3052_v51 }
 0x105   :  { %846 = vmatprep.subr.mxu1 %v3058_v52 }
 0x106   :  { %847 = vmatpush1.msra.mxu1 %v3066_v53 }
 0x107   :  { %848 = vmatprep.subr.mxu1 %v3078_v55 }
 0x108   :  { %849 = vmatpush1.msra.mxu1 %v3084_v56 }
 0x109   :  { %850 = vmatprep.subr.mxu1 %v3090_v57 }
 0x10a   :  { %851 = vmatpush1.msra.mxu1 %v3098_v58 }
 0x10b   :  { %852 = vmatprep.subr.mxu1 %v3110_v60 }
 0x10c   :  { %853 = vmatpush1.msra.mxu1 %v3116_v61 }
 0x10d   :  { %854 = vmatprep.subr.mxu1 %v3122_v62 }
 0x10e   :  { %855 = vmatpush1.msra.mxu1 %v3130_v63 }
 0x10f   :  { %856 = vmatprep.subr.mxu1 %v3142_v2 }
 0x110   :  { %857 = vmatpush1.msra.mxu1 %v3148_v3 }
 0x111   :  { %858 = vmatprep.subr.mxu1 %v3154_v4 }
 0x112   :  { %859 = vmatpush1.msra.mxu1 %v3162_v5 }
 0x113   :  { %860 = vmatprep.subr.mxu1 %v3174_v7 }
 0x114   :  { %861 = vmatpush1.msra.mxu1 %v3180_v8 }
 0x115   :  { %862 = vmatprep.subr.mxu1 %v3186_v9 }
 0x116   :  { %863 = vmatpush1.msra.mxu1 %v3194_v10  ;;  %v3590_v10 = vld [vmem:[%s4659_s3 + $0x70] sm:$0xff] }
 0x117   :  { %864 = vmatprep.subr.mxu1 %v3206_v12  ;;  %4788 = vst [vmem:[#allocation46_spill] sm:$0xff] %v3590_v10 }
 0x118   :  { %865 = vmatpush1.msra.mxu1 %v3212_v13  ;;  %v3557_v13 = vld [vmem:[%s4659_s3 + $0xb0] sm:$0xff] }
 0x119   :  { %866 = vmatprep.subr.mxu1 %v3218_v14  ;;  %4782 = vst [vmem:[#allocation40_spill] sm:$0xff] %v3557_v13 }
 0x11a   :  { %867 = vmatpush1.msra.mxu1 %v3226_v15 }
 0x11b   :  { %868 = vmatprep.subr.mxu1 %v3238_v17  ;;  %v3524_v17 = vld [vmem:[%s4659_s3 + $0xf0] sm:$0xff] }
 0x11c   :  { %869 = vmatpush1.msra.mxu1 %v3244_v18  ;;  %4776 = vst [vmem:[#allocation34_spill] sm:$0xff] %v3524_v17 }
 0x11d   :  { %870 = vmatprep.subr.mxu1 %v3250_v19 }
 0x11e   :  { %871 = vmatpush1.msra.mxu1 %v3258_v20  ;;  %v3491_v20 = vld [vmem:[%s4659_s3 + $0x130] sm:$0xff] }
 0x11f   :  { %1010 = vmatprep.subr.mxu1 %v3016_v45 }
 0x19b   :  { %v206_v27 = vpop.f32.mrf.mxu1 }
 0x19c   :  { %v207_v28 = vadd.f32 %v2343_v25, %v206_v27  ;;  %v3375_v25 = vld [vmem:[%s4659_s3 + $0x210] sm:$0xff] }
 0x19d   :  { %v2522_v29 = vpop.f32.mrf.mxu1 }
 0x19e   :  { %v210_v30 = vmax.f32 %v207_v28, 0.0  ;;  %v3384_v28 = vld [vmem:[%s4659_s3 + $0x1f8] sm:$0xff] }
 0x19f   :  { %v3318_v35 = vpop.f32.mrf.mxu1 }
 0x1a0   :  { %2556 = vmatmul.mubr.f32.vlgmr.msra.gmra.mxu0 %v210_v30  ;;  %v3392_v30 = vld [vmem:[%s4659_s3 + $0x1f0] sm:$0xff] }
 0x1a1   :  { %2357 = vmatpush1.msk.msra.mxu0 %vm431_vm2, %v309_v31  ;;  %621 = vmatprep.mubr.f32.mxu0 %v4664_v0  ;;  %v3331_v39 = vpop.f32.mrf.mxu1 }
 0x1a2   :  { %587 = vmatprep.subr.mxu0 %v306_v33  ;;  %v3402_v33 = vld [vmem:[%s4659_s3 + $0x1d8] sm:$0xff] }
 0x1a3   :  { %588 = vmatpush1.msra.mxu0 %v305_v36  ;;  %v516_v43 = vpop.f32.mrf.mxu1 }
 0x1a4   :  { %741 = vmatprep.subr.mxu0 %v3329_v38  ;;  %2358 = vmatmul.mubr.msk.f32.vlgmr.msra.gmra.mxu0 %vm406_vm3, %v3011_v44  ;;  %v3362_v23 = vadd.f32 %v516_v43, %v3341_v41  ;;  %v3369_v44 = vld [vmem:[%s4659_s3 + $0x218] sm:$0xff] }
 0x1a5   :  { %742 = vmatpush1.msra.mxu0 %v3336_v40  ;;  %627 = vmatprep.mubr.f32.mxu0 %v4664_v0  ;;  %v518_v24 = vpop.f32.mrf.mxu1 }
 0x1a6   :  { %4763 = vst [vmem:[#allocation22_spill] sm:$0xff] %v3362_v23  ;;  %743 = vmatprep.subr.mxu0 %v3346_v42  ;;  %v3378_v27 = vadd.f32 %v518_v24, %v3359_v22  ;;  %v3417_v24 = vld [vmem:[%s4659_s3 + $0x1b8] sm:$0xff] }
 0x1a7   :  { %744 = vmatpush1.msra.mxu0 %v3354_v21  ;;  %v522_v29 = vpop.f32.mrf.mxu1 }
 0x1a8   :  { %4764 = vst [vmem:[#allocation23_spill] sm:$0xff] %v3378_v27  ;;  %745 = vmatprep.subr.mxu0 %v3369_v44  ;;  %2359 = vmatmul.mubr.msk.f32.gmra.mxu0 %vm406_vm3, %v3041_v49  ;;  %v3395_v31 = vadd.f32 %v522_v29, %v3341_v41  ;;  %v3408_v49 = vld [vmem:[%s4659_s3 + $0x1d0] sm:$0xff]  ;;  %v3468_v27 = vld [vmem:[%s4659_s3 + $0x158] sm:$0xff] }
 0x1a9   :  { %746 = vmatpush1.msra.mxu0 %v3375_v25  ;;  %633 = vmatprep.mubr.f32.mxu0 %v4664_v0  ;;  %v524_v36 = vpop.f32.mrf.mxu1 }
 0x1aa   :  { %4765 = vst [vmem:[#allocation24_spill] sm:$0xff] %v3395_v31  ;;  %747 = vmatprep.subr.mxu0 %v3384_v28  ;;  %v3411_v43 = vadd.f32 %v524_v36, %v3359_v22  ;;  %v3458_v31 = vld [vmem:[%s4659_s3 + $0x170] sm:$0xff] }
 0x1ab   :  { %748 = vmatpush1.msra.mxu0 %v3392_v30  ;;  %v528_v29 = vpop.f32.mrf.mxu1 }
 0x1ac   :  { %4766 = vst [vmem:[#allocation25_spill] sm:$0xff] %v3411_v43  ;;  %749 = vmatprep.subr.mxu0 %v3402_v33  ;;  %2360 = vmatmul.mubr.msk.f32.gmra.mxu0 %vm406_vm3, %v3073_v54  ;;  %v3428_v36 = vadd.f32 %v528_v29, %v3341_v41  ;;  %v3441_v54 = vld [vmem:[%s4659_s3 + $0x190] sm:$0xff] }
 0x1ad   :  { %750 = vmatpush1.msra.mxu0 %v3408_v49  ;;  %639 = vmatprep.mubr.f32.mxu0 %v4664_v0  ;;  %v530_v43 = vpop.f32.mrf.mxu1  ;;  %v3450_v0 = vld [vmem:[%s4659_s3 + $0x178] sm:$0xff] }
 0x1ae   :  { %4767 = vst [vmem:[#allocation26_spill] sm:$0xff] %v3428_v36  ;;  %751 = vmatprep.subr.mxu0 %v3417_v24  ;;  %v3444_v29 = vadd.f32 %v530_v43, %v3359_v22 }
 0x1af   :  { %752 = vmatpush1.msra.mxu0 %v3425_v37  ;;  %v534_v36 = vpop.f32.mrf.mxu1 }
 0x1b0   :  { %4768 = vst [vmem:[#allocation27_spill] sm:$0xff] %v3444_v29  ;;  %753 = vmatprep.subr.mxu0 %v3435_v32  ;;  %2361 = vmatmul.mubr.msk.f32.gmra.mxu0 %vm406_vm3, %v3105_v59  ;;  %v3461_v43 = vadd.f32 %v534_v36, %v3341_v41  ;;  %v4770_v29 = vmov 0.0   ;;  %v3474_v59 = vld [vmem:[%s4659_s3 + $0x150] sm:$0xff] }
 0x1b1   :  { %754 = vmatpush1.msra.mxu0 %v3441_v54  ;;  %645 = vmatprep.mubr.f32.mxu0 %v4770_v29  ;;  %v536_v23 = vpop.f32.mrf.mxu1 }
 0x1b2   :  { %4769 = vst [vmem:[#allocation28_spill] sm:$0xff] %v3461_v43  ;;  %755 = vmatprep.subr.mxu0 %v3450_v0  ;;  %v3477_v36 = vadd.f32 %v536_v23, %v3359_v22  ;;  %v3483_v43 = vld [vmem:[%s4659_s3 + $0x138] sm:$0xff] }
 0x1b3   :  { %756 = vmatpush1.msra.mxu0 %v3458_v31  ;;  %v540_v45 = vpop.f32.mrf.mxu1 }
 0x1b4   :  { %4771 = vst [vmem:[#allocation29_spill] sm:$0xff] %v3477_v36  ;;  %757 = vmatprep.subr.mxu0 %v3468_v27  ;;  %2362 = vmatmul.mubr.msk.f32.gmra.mxu0 %vm406_vm3, %v3137_v1  ;;  %v3494_v23 = vadd.f32 %v540_v45, %v3341_v41  ;;  %v3501_v36 = vld [vmem:[%s4659_s3 + $0x118] sm:$0xff]  ;;  %v3507_v1 = vld [vmem:[%s4659_s3 + $0x110] sm:$0xff] }
 0x1b5   :  { %758 = vmatpush1.msra.mxu0 %v3474_v59  ;;  %651 = vmatprep.mubr.f32.mxu0 %v4770_v29  ;;  %v542_v19 = vpop.f32.mrf.mxu1  ;;  %4773 = vst [vmem:[#allocation31_spill] sm:$0xff] %v3507_v1 }
 0x1b6   :  { %4772 = vst [vmem:[#allocation30_spill] sm:$0xff] %v3494_v23  ;;  %759 = vmatprep.subr.mxu0 %v3483_v43  ;;  %v3510_v45 = vadd.f32 %v542_v19, %v3359_v22  ;;  %v3516_v23 = vld [vmem:[%s4659_s3 + $0xf8] sm:$0xff] }
 0x1b7   :  { %760 = vmatpush1.msra.mxu0 %v3491_v20  ;;  %4775 = vst [vmem:[#allocation33_spill] sm:$0xff] %v3516_v23  ;;  %v546_v18 = vpop.f32.mrf.mxu1 }
 0x1b8   :  { %4774 = vst [vmem:[#allocation32_spill] sm:$0xff] %v3510_v45  ;;  %761 = vmatprep.subr.mxu0 %v3501_v36  ;;  %2363 = vmatmul.mubr.msk.f32.gmra.mxu0 %vm406_vm3, %v3169_v6  ;;  %v3527_v19 = vadd.f32 %v546_v18, %v3341_v41  ;;  %v3534_v45 = vld [vmem:[%s4659_s3 + $0xd8] sm:$0xff]  ;;  %v3540_v6 = vld [vmem:[%s4659_s3 + $0xd0] sm:$0xff] }
 0x1b9   :  { %762 = vmatpush1.msra.mxu0 %v3507_v1  ;;  %657 = vmatprep.mubr.f32.mxu0 %v4770_v29  ;;  %4778 = vst [vmem:[#allocation36_spill] sm:$0xff] %v3534_v45  ;;  %v548_v15 = vpop.f32.mrf.mxu1  ;;  %4779 = vst [vmem:[#allocation37_spill] sm:$0xff] %v3540_v6 }
 0x1ba   :  { %4777 = vst [vmem:[#allocation35_spill] sm:$0xff] %v3527_v19  ;;  %763 = vmatprep.subr.mxu0 %v3516_v23  ;;  %v3543_v18 = vadd.f32 %v548_v15, %v3359_v22  ;;  %v3549_v19 = vld [vmem:[%s4659_s3 + $0xb8] sm:$0xff] }
 0x1bb   :  { %764 = vmatpush1.msra.mxu0 %v3524_v17  ;;  %4781 = vst [vmem:[#allocation39_spill] sm:$0xff] %v3549_v19  ;;  %v552_v14 = vpop.f32.mrf.mxu1 }
 0x1bc   :  { %4780 = vst [vmem:[#allocation38_spill] sm:$0xff] %v3543_v18  ;;  %765 = vmatprep.subr.mxu0 %v3534_v45  ;;  %2364 = vmatmul.mubr.msk.f32.gmra.mxu0 %vm406_vm3, %v3201_v11  ;;  %v3560_v15 = vadd.f32 %v552_v14, %v3341_v41  ;;  %v3567_v18 = vld [vmem:[%s4659_s3 + $0x98] sm:$0xff]  ;;  %v3573_v11 = vld [vmem:[%s4659_s3 + $0x90] sm:$0xff] }
 0x1bd   :  { %766 = vmatpush1.msra.mxu0 %v3540_v6  ;;  %663 = vmatprep.mubr.f32.mxu0 %v4770_v29  ;;  %4784 = vst [vmem:[#allocation42_spill] sm:$0xff] %v3567_v18  ;;  %v554_v12 = vpop.f32.mrf.mxu1  ;;  %4785 = vst [vmem:[#allocation43_spill] sm:$0xff] %v3573_v11 }
 0x1be   :  { %4783 = vst [vmem:[#allocation41_spill] sm:$0xff] %v3560_v15  ;;  %767 = vmatprep.subr.mxu0 %v3549_v19  ;;  %v3576_v14 = vadd.f32 %v554_v12, %v3359_v22  ;;  %v3582_v15 = vld [vmem:[%s4659_s3 + $0x78] sm:$0xff] }
 0x1bf   :  { %768 = vmatpush1.msra.mxu0 %v3557_v13  ;;  %4787 = vst [vmem:[#allocation45_spill] sm:$0xff] %v3582_v15 }
 0x1c0   :  { %4786 = vst [vmem:[#allocation44_spill] sm:$0xff] %v3576_v14  ;;  %769 = vmatprep.subr.mxu0 %v3567_v18  ;;  %2365 = vmatmul.mubr.msk.f32.gmra.mxu0 %vm406_vm3, %v3233_v16  ;;  %v736_v16 = vpop.f32.mrf.mxu1 }
 0x1c1   :  { %770 = vmatpush1.msra.mxu0 %v3573_v11  ;;  %805 = vmatprep.mubr.f32.mxu0 %v4770_v29 }
 0x1c2   :  { %771 = vmatprep.subr.mxu0 %v3582_v15 }
 0x1c3   :  { %772 = vmatpush1.msra.mxu0 %v3590_v10 }
 0x1c4   :  { %806 = vmatmul.mubr.f32.vlgmr.msra.gmra.mxu0 %v4770_v29  ;;  %911 = vmatprep.subr.mxu0 %v3329_v38 }
 0x1c5   :  { %912 = vmatpush1.msra.mxu0 %v3336_v40  ;;  %975 = vmatprep.mubr.f32.mxu0 %v4770_v29  ;;  %v4714_v29 = vsub.s32 2, %v3304_v26 }
 0x1c6   :  { %913 = vmatprep.subr.mxu0 %v3346_v42 }
 0x1c7   :  { %914 = vmatpush1.msra.mxu0 %v3354_v21 }
 0x1c8   :  { %915 = vmatprep.subr.mxu0 %v3369_v44 }
 0x1c9   :  { %916 = vmatpush1.msra.mxu0 %v3375_v25 }
 0x1ca   :  { %917 = vmatprep.subr.mxu0 %v3384_v28 }
 0x1cb   :  { %918 = vmatpush1.msra.mxu0 %v3392_v30 }
 0x1cc   :  { %919 = vmatprep.subr.mxu0 %v3402_v33 }
 0x1cd   :  { %920 = vmatpush1.msra.mxu0 %v3408_v49 }
 0x1ce   :  { %921 = vmatprep.subr.mxu0 %v3417_v24 }
 0x1cf   :  { %922 = vmatpush1.msra.mxu0 %v3425_v37 }
 0x1d0   :  { %923 = vmatprep.subr.mxu0 %v3435_v32 }
 0x1d1   :  { %924 = vmatpush1.msra.mxu0 %v3441_v54 }
 0x1d2   :  { %925 = vmatprep.subr.mxu0 %v3450_v0 }
 0x1d3   :  { %926 = vmatpush1.msra.mxu0 %v3458_v31 }
 0x1d4   :  { %927 = vmatprep.subr.mxu0 %v3468_v27 }
 0x1d5   :  { %928 = vmatpush1.msra.mxu0 %v3474_v59 }
 0x1d6   :  { %929 = vmatprep.subr.mxu0 %v3483_v43 }
 0x1d7   :  { %930 = vmatpush1.msra.mxu0 %v3491_v20 }
 0x1d8   :  { %931 = vmatprep.subr.mxu0 %v3501_v36 }
 0x1d9   :  { %932 = vmatpush1.msra.mxu0 %v3507_v1 }
 0x1da   :  { %933 = vmatprep.subr.mxu0 %v3516_v23 }
 0x1db   :  { %934 = vmatpush1.msra.mxu0 %v3524_v17 }
 0x1dc   :  { %935 = vmatprep.subr.mxu0 %v3534_v45 }
 0x1dd   :  { %936 = vmatpush1.msra.mxu0 %v3540_v6 }
 0x1de   :  { %937 = vmatprep.subr.mxu0 %v3549_v19 }
 0x1df   :  { %938 = vmatpush1.msra.mxu0 %v3557_v13  ;;  %v513_v13 = vadd.f32 %v3331_v39, %v3359_v22 }
 0x1e0   :  { %939 = vmatprep.subr.mxu0 %v3567_v18  ;;  %v4715_v18 = vsub.s32 3, %v3304_v26 }
 0x1e1   :  { %940 = vmatpush1.msra.mxu0 %v3573_v11  ;;  %v511_v11 = vadd.f32 %v3318_v35, %v3341_v41 }
 0x1e2   :  { %941 = vmatprep.subr.mxu0 %v3582_v15  ;;  %v738_v15 = vpop.f32.mrf.mxu1 }
 0x1e3   :  { %942 = vmatpush1.msra.mxu0 %v3590_v10  ;;  %v813_v10 = vadd.f32 %v738_v15, %v513_v13  ;;  %v812_v39 = vadd.f32 %v736_v16, %v511_v11 }
 0x1e4   :  { %1081 = vmatprep.subr.mxu0 %v3329_v38  ;;  %v397_v38 = vrot.slane %v3316_v34, %v4714_v29 }
 0x1e5   :  { %v2367_v35 = vmul.f32 -1.442695, %v813_v10  ;;  %v2366_v9 = vmul.f32 -1.442695, %v812_v39 }
 0x1e7   :  { %2672 = vpow2.f32 %v2367_v35 }
 0x1e8   :  { %2674 = vpow2.f32 %v2366_v9 }
 0x260   :  { %v3631_v12 = vpop.f32.mrf.mxu0 }
 0x261   :  { %4789 = vst [vmem:[#allocation47_spill] sm:$0xff] %v3631_v12 }
 0x262   :  { %v2557_v14 = vpop.f32.mrf.mxu0 }
 0x263   :  { %v401_v14 = vrot.slane %v3316_v34, %v4715_v18 }
 0x264   :  { %v623_v6 = vpop.f32.mrf.mxu0 }
 0x266   :  { %v625_v19 = vpop.f32.mrf.mxu0 }
 0x268   :  { %v629_v12 = vpop.f32.mrf.mxu0 }
 0x269   :  { %v3645_v45 = vadd.f32 %v629_v12, %v397_v38 }
 0x26a   :  { %v631_v22 = vpop.f32.mrf.mxu0 }
 0x26b   :  { %v3647_v17 = vadd.f32 %v631_v22, %v401_v14 }
 0x26c   :  { %v635_v23 = vpop.f32.mrf.mxu0 }
 0x26d   :  { %v3649_v41 = vadd.f32 %v635_v23, %v397_v38 }
 0x26e   :  { %v637_v1 = vpop.f32.mrf.mxu0 }
 0x26f   :  { %4790 = vst [vmem:[#allocation48_spill] sm:$0xff] %v3649_v41  ;;  %v3651_v8 = vadd.f32 %v637_v1, %v401_v14 }
 0x270   :  { %v641_v29 = vpop.f32.mrf.mxu0 }
 0x271   :  { %4791 = vst [vmem:[#allocation49_spill] sm:$0xff] %v3651_v8  ;;  %v3653_v13 = vadd.f32 %v641_v29, %v397_v38  ;;  %v2673_v29 = vpop.eup %2672  ;;  %v4822_v8 = vld [vmem:[#allocation19_spill] sm:$0xff] }
 0x272   :  { %v643_v34 = vpop.f32.mrf.mxu0  ;;  %v2675_v26 = vpop.eup %2674 }
 0x273   :  { %4792 = vst [vmem:[#allocation50_spill] sm:$0xff] %v3653_v13  ;;  %v3655_v15 = vadd.f32 %v643_v34, %v401_v14 }
 0x274   :  { %v647_v11 = vpop.f32.mrf.mxu0 }
 0x275   :  { %4793 = vst [vmem:[#allocation51_spill] sm:$0xff] %v3655_v15  ;;  %v3657_v12 = vadd.f32 %v647_v11, %v397_v38  ;;  %v825_v11 = vadd.f32 1.0, %v2673_v29  ;;  %v624_v15 = vadd.f32 %v623_v6, %v397_v38 }
 0x276   :  { %v649_v16 = vpop.f32.mrf.mxu0 }
 0x277   :  { %4794 = vst [vmem:[#allocation52_spill] sm:$0xff] %v3657_v12  ;;  %v3659_v22 = vadd.f32 %v649_v16, %v401_v14  ;;  %v819_v16 = vadd.f32 1.0, %v2675_v26  ;;  %2676 = vrcp.f32 %v825_v11  ;;  %v4809_v11 = vld [vmem:[#allocation36_spill] sm:$0xff] }
 0x278   :  { %v653_v10 = vpop.f32.mrf.mxu0 }
 0x279   :  { %4795 = vst [vmem:[#allocation53_spill] sm:$0xff] %v3659_v22  ;;  %v3661_v23 = vadd.f32 %v653_v10, %v397_v38  ;;  %2678 = vrcp.f32 %v819_v16  ;;  %v4810_v16 = vld [vmem:[#allocation13_spill] sm:$0xff] }
 0x27a   :  { %v655_v39 = vpop.f32.mrf.mxu0 }
 0x27b   :  { %4796 = vst [vmem:[#allocation54_spill] sm:$0xff] %v3661_v23  ;;  %v3663_v1 = vadd.f32 %v655_v39, %v401_v14  ;;  %v626_v39 = vadd.f32 %v625_v19, %v401_v14 }
 0x27c   :  { %v659_v18 = vpop.f32.mrf.mxu0 }
 0x27d   :  { %4797 = vst [vmem:[#allocation55_spill] sm:$0xff] %v3663_v1  ;;  %v3665_v35 = vadd.f32 %v659_v18, %v397_v38 }
 0x27e   :  { %v661_v9 = vpop.f32.mrf.mxu0 }
 0x27f   :  { %4798 = vst [vmem:[#allocation56_spill] sm:$0xff] %v3665_v35  ;;  %v3667_v34 = vadd.f32 %v661_v9, %v401_v14 }
 0x280   :  { %v665_v13 = vpop.f32.mrf.mxu0 }
 0x281   :  { %4799 = vst [vmem:[#allocation57_spill] sm:$0xff] %v3667_v34  ;;  %v3669_v12 = vadd.f32 %v665_v13, %v397_v38 }
 0x282   :  { %v667_v22 = vpop.f32.mrf.mxu0 }
 0x283   :  { %4800 = vst [vmem:[#allocation58_spill] sm:$0xff] %v3669_v12  ;;  %v3671_v10 = vadd.f32 %v667_v22, %v401_v14  ;;  %v4804_v22 = vld [vmem:[#allocation10_spill] sm:$0xff] }
 0x284   :  { %v807_v23 = vpop.f32.mrf.mxu0  ;;  %v2677_v9 = vpop.eup %2676 }
 0x285   :  { %4801 = vst [vmem:[#allocation59_spill] sm:$0xff] %v3671_v10  ;;  %v814_v1 = vadd.f32 %v807_v23, %v624_v15  ;;  %v835_v13 = vmul.f32 0.0, %v2677_v9  ;;  %v4805_v23 = vld [vmem:[#allocation33_spill] sm:$0xff]  ;;  %v4813_v9 = vld [vmem:[#allocation39_spill] sm:$0xff] }
 0x286   :  { %v809_v18 = vpop.f32.mrf.mxu0  ;;  %v2679_v34 = vpop.eup %2678  ;;  %v4821_v10 = vld [vmem:[#allocation45_spill] sm:$0xff] }
 0x287   :  { %2680 = vtanh.f32 %v814_v1  ;;  %v815_v35 = vadd.f32 %v809_v18, %v626_v39  ;;  %v4806_v1 = vld [vmem:[#allocation11_spill] sm:$0xff]  ;;  %v4811_v39 = vld [vmem:[#allocation37_spill] sm:$0xff]  ;;  %v4812_v18 = vld [vmem:[#allocation14_spill] sm:$0xff] }
 0x289   :  { %v2368_v41 = vmul.f32 -1.442695, %v815_v35  ;;  %v4807_v35 = vld [vmem:[#allocation34_spill] sm:$0xff] }
 0x28b   :  { %2682 = vpow2.f32 %v2368_v41  ;;  %v4802_v41 = vld [vmem:[#allocation9_spill] sm:$0xff] }
 0x294   :  { %v2681_v29 = vpop.eup %2680 }
 0x295   :  { %v836_v12 = vmul.f32 %v2681_v29, %v2679_v34  ;;  %v4808_v34 = vld [vmem:[#allocation12_spill] sm:$0xff]  ;;  %v4814_v29 = vld [vmem:[#allocation15_spill] sm:$0xff] }
 0x297   :  { %v3673_v26 = vadd.f32 %v836_v12, %v835_v13  ;;  %v4803_v12 = vld [vmem:[#allocation31_spill] sm:$0xff]  ;;  %v4815_v13 = vld [vmem:[#allocation40_spill] sm:$0xff] }
 0x298   :  { %v2683_v38 = vpop.eup %2682 }
 0x299   :  { %v832_v6 = vadd.f32 1.0, %v2683_v38  ;;  %2684 = vtanh.f32 %v3673_v26  ;;  %v4816_v38 = vld [vmem:[#allocation16_spill] sm:$0xff] }
 0x29b   :  { %2686 = vrcp.f32 %v832_v6  ;;  %v4817_v6 = vld [vmem:[#allocation42_spill] sm:$0xff] }
 0x2a6   :  { %v2685_v19 = vpop.eup %2684 }
 0x2a8   :  { %v2687_v14 = vpop.eup %2686 }
 0x2a9   :  { %v839_v15 = vmul.f32 %v2687_v14, %v2685_v19  ;;  %v4818_v19 = vld [vmem:[#allocation17_spill] sm:$0xff]  ;;  %v4819_v14 = vld [vmem:[#allocation43_spill] sm:$0xff] }
 0x2ab   :  { %905 = vmatmul.mubr.f32.vlgmr.msra.gmra.mxu1 %v839_v15  ;;  %976 = vmatmul.mubr.f32.vlgmr.msra.gmra.mxu0 %v839_v15  ;;  %v4820_v15 = vld [vmem:[#allocation18_spill] sm:$0xff] }
 0x2ac   :  { %1011 = vmatpush1.msra.mxu1 %v3021_v46  ;;  %1082 = vmatpush1.msra.mxu0 %v3336_v40 }
 0x2ad   :  { %1012 = vmatprep.subr.mxu1 %v3026_v47  ;;  %1083 = vmatprep.subr.mxu0 %v3346_v42 }
 0x2ae   :  { %1013 = vmatpush1.msra.mxu1 %v3034_v48  ;;  %1084 = vmatpush1.msra.mxu0 %v3354_v21 }
 0x2af   :  { %1014 = vmatprep.subr.mxu1 %v3046_v50  ;;  %1085 = vmatprep.subr.mxu0 %v3369_v44 }
 0x2b0   :  { %1015 = vmatpush1.msra.mxu1 %v3052_v51  ;;  %1086 = vmatpush1.msra.mxu0 %v3375_v25 }
 0x2b1   :  { %1016 = vmatprep.subr.mxu1 %v3058_v52  ;;  %1087 = vmatprep.subr.mxu0 %v3384_v28 }
 0x2b2   :  { %1017 = vmatpush1.msra.mxu1 %v3066_v53  ;;  %1088 = vmatpush1.msra.mxu0 %v3392_v30 }
 0x2b3   :  { %1018 = vmatprep.subr.mxu1 %v3078_v55  ;;  %1089 = vmatprep.subr.mxu0 %v3402_v33 }
 0x2b4   :  { %1019 = vmatpush1.msra.mxu1 %v3084_v56  ;;  %1090 = vmatpush1.msra.mxu0 %v3408_v49 }
 0x2b5   :  { %1020 = vmatprep.subr.mxu1 %v3090_v57  ;;  %1091 = vmatprep.subr.mxu0 %v3417_v24 }
 0x2b6   :  { %1021 = vmatpush1.msra.mxu1 %v3098_v58  ;;  %1092 = vmatpush1.msra.mxu0 %v3425_v37 }
 0x2b7   :  { %1022 = vmatprep.subr.mxu1 %v3110_v60  ;;  %1093 = vmatprep.subr.mxu0 %v3435_v32 }
 0x2b8   :  { %1023 = vmatpush1.msra.mxu1 %v3116_v61  ;;  %1094 = vmatpush1.msra.mxu0 %v3441_v54 }
 0x2b9   :  { %1024 = vmatprep.subr.mxu1 %v3122_v62  ;;  %1095 = vmatprep.subr.mxu0 %v3450_v0 }
 0x2ba   :  { %1025 = vmatpush1.msra.mxu1 %v3130_v63  ;;  %1096 = vmatpush1.msra.mxu0 %v3458_v31 }
 0x2bb   :  { %1026 = vmatprep.subr.mxu1 %v3142_v2  ;;  %1097 = vmatprep.subr.mxu0 %v3468_v27 }
 0x2bc   :  { %1027 = vmatpush1.msra.mxu1 %v3148_v3  ;;  %1098 = vmatpush1.msra.mxu0 %v3474_v59 }
 0x2bd   :  { %1028 = vmatprep.subr.mxu1 %v3154_v4  ;;  %1099 = vmatprep.subr.mxu0 %v3483_v43 }
 0x2be   :  { %1029 = vmatpush1.msra.mxu1 %v3162_v5  ;;  %1100 = vmatpush1.msra.mxu0 %v3491_v20 }
 0x2bf   :  { %1030 = vmatprep.subr.mxu1 %v3174_v7  ;;  %1101 = vmatprep.subr.mxu0 %v3501_v36 }
 0x2c0   :  { %1031 = vmatpush1.msra.mxu1 %v4802_v41  ;;  %1102 = vmatpush1.msra.mxu0 %v4803_v12 }
 0x2c1   :  { %1032 = vmatprep.subr.mxu1 %v4804_v22  ;;  %1103 = vmatprep.subr.mxu0 %v4805_v23 }
 0x2c2   :  { %1033 = vmatpush1.msra.mxu1 %v4806_v1  ;;  %1104 = vmatpush1.msra.mxu0 %v4807_v35 }
 0x2c3   :  { %1034 = vmatprep.subr.mxu1 %v4808_v34  ;;  %1105 = vmatprep.subr.mxu0 %v4809_v11 }
 0x2c4   :  { %1035 = vmatpush1.msra.mxu1 %v4810_v16  ;;  %1106 = vmatpush1.msra.mxu0 %v4811_v39 }
 0x2c5   :  { %1036 = vmatprep.subr.mxu1 %v4812_v18  ;;  %1107 = vmatprep.subr.mxu0 %v4813_v9  ;;  %v4823_v18 = vmov 0.0   ;;  %v4824_v9 = vld [vmem:[#allocation46_spill] sm:$0xff] }
 0x2c6   :  { %1037 = vmatpush1.msra.mxu1 %v4814_v29  ;;  %1108 = vmatpush1.msra.mxu0 %v4815_v13  ;;  %v4825_v13 = vld [vmem:[#allocation8_spill] sm:$0xff] }
 0x2c7   :  { %1038 = vmatprep.subr.mxu1 %v4816_v38  ;;  %1109 = vmatprep.subr.mxu0 %v4817_v6  ;;  %v4826_v38 = vld [vmem:[#allocation21_spill] sm:$0xff] }
 0x2c8   :  { %1039 = vmatpush1.msra.mxu1 %v4818_v19  ;;  %1110 = vmatpush1.msra.mxu0 %v4819_v14  ;;  %v4827_v19 = vld [vmem:[#allocation22_spill] sm:$0xff] }
 0x2c9   :  { %1040 = vmatprep.subr.mxu1 %v4820_v15  ;;  %1111 = vmatprep.subr.mxu0 %v4821_v10  ;;  %v4828_v15 = vld [vmem:[#allocation23_spill] sm:$0xff] }
 0x2ca   :  { %1041 = vmatpush1.msra.mxu1 %v4822_v8  ;;  %1074 = vmatprep.mubr.f32.mxu1 %v4823_v18 }
 0x2cb   :  { %1112 = vmatpush1.msra.mxu0 %v4824_v9  ;;  %1145 = vmatprep.mubr.f32.mxu0 %v4823_v18 }
 0x2cc   :  { %1180 = vmatprep.subr.mxu1 %v4825_v13  ;;  %1251 = vmatprep.subr.mxu0 %v4826_v38 }
 0x36b   :  { %v906_v6 = vpop.f32.mrf.mxu1  ;;  %v977_v10 = vpop.f32.mrf.mxu0 }
 0x36c   :  { %v982_v29 = vadd.f32 %v906_v6, %v4827_v19  ;;  %v984_v18 = vadd.f32 %v977_v10, %v3645_v45 }
 0x36d   :  { %v908_v14 = vpop.f32.mrf.mxu1  ;;  %v979_v11 = vpop.f32.mrf.mxu0 }
 0x36e   :  { %v2369_v39 = vmul.f32 -1.442695, %v982_v29  ;;  %v983_v16 = vadd.f32 %v908_v14, %v4828_v15  ;;  %v985_v9 = vadd.f32 %v979_v11, %v3647_v17 }
 0x370   :  { %2688 = vpow2.f32 %v2369_v39  ;;  %v2370_v8 = vmul.f32 -1.442695, %v983_v16  ;;  %v2371_v34 = vmul.f32 -1.442695, %v985_v9 }
 0x372   :  { %2690 = vpow2.f32 %v2370_v8 }
 0x373   :  { %2692 = vtanh.f32 %v984_v18 }
 0x374   :  { %2694 = vpow2.f32 %v2371_v34  ;;  %v4850_v34 = vld [vmem:[#allocation25_spill] sm:$0xff] }
 0x37d   :  { %v2689_v13 = vpop.eup %2688 }
 0x37e   :  { %v989_v35 = vadd.f32 1.0, %v2689_v13 }
 0x37f   :  { %v2691_v38 = vpop.eup %2690 }
 0x380   :  { %2696 = vrcp.f32 %v989_v35  ;;  %v995_v6 = vadd.f32 1.0, %v2691_v38  ;;  %v2693_v29 = vpop.eup %2692 }
 0x381   :  { %v2695_v19 = vpop.eup %2694 }
 0x382   :  { %2698 = vrcp.f32 %v995_v6  ;;  %v1002_v8 = vadd.f32 1.0, %v2695_v19  ;;  %v4851_v6 = vld [vmem:[#allocation49_spill] sm:$0xff]  ;;  %v4852_v19 = vld [vmem:[#allocation48_spill] sm:$0xff] }
 0x384   :  { %2700 = vrcp.f32 %v1002_v8 }
 0x38d   :  { %v2697_v39 = vpop.eup %2696 }
 0x38e   :  { %v1006_v14 = vmul.f32 %v2697_v39, %v2693_v29 }
 0x38f   :  { %v2699_v16 = vpop.eup %2698 }
 0x390   :  { %v1005_v15 = vmul.f32 %v2699_v16, %v3673_v26 }
 0x391   :  { %v2701_v45 = vpop.eup %2700 }
 0x392   :  { %v3747_v17 = vadd.f32 %v1006_v14, %v1005_v15 }
 0x394   :  { %2702 = vtanh.f32 %v3747_v17 }
 0x3a1   :  { %v2703_v10 = vpop.eup %2702 }
 0x3a2   :  { %v1009_v11 = vmul.f32 %v2703_v10, %v2701_v45 }
 0x3a4   :  { %1075 = vmatmul.mubr.f32.vlgmr.msra.gmra.mxu1 %v1009_v11  ;;  %1146 = vmatmul.mubr.f32.vlgmr.msra.gmra.mxu0 %v1009_v11 }
 0x3a5   :  { %1181 = vmatpush1.msra.mxu1 %v3021_v46  ;;  %1252 = vmatpush1.msra.mxu0 %v3336_v40  ;;  %v4829_v46 = vld [vmem:[#allocation34_spill] sm:$0xff] }
 0x3a6   :  { %1182 = vmatprep.subr.mxu1 %v3026_v47  ;;  %1253 = vmatprep.subr.mxu0 %v3346_v42  ;;  %v4830_v47 = vld [vmem:[#allocation12_spill] sm:$0xff] }
 0x3a7   :  { %1183 = vmatpush1.msra.mxu1 %v3034_v48  ;;  %1254 = vmatpush1.msra.mxu0 %v3354_v21  ;;  %v4831_v48 = vld [vmem:[#allocation36_spill] sm:$0xff] }
 0x3a8   :  { %1184 = vmatprep.subr.mxu1 %v3046_v50  ;;  %1255 = vmatprep.subr.mxu0 %v3369_v44  ;;  %v4832_v50 = vld [vmem:[#allocation13_spill] sm:$0xff] }
 0x3a9   :  { %1185 = vmatpush1.msra.mxu1 %v3052_v51  ;;  %1256 = vmatpush1.msra.mxu0 %v3375_v25  ;;  %v4833_v51 = vld [vmem:[#allocation37_spill] sm:$0xff] }
 0x3aa   :  { %1186 = vmatprep.subr.mxu1 %v3058_v52  ;;  %1257 = vmatprep.subr.mxu0 %v3384_v28  ;;  %v4834_v52 = vld [vmem:[#allocation14_spill] sm:$0xff] }
 0x3ab   :  { %1187 = vmatpush1.msra.mxu1 %v3066_v53  ;;  %1258 = vmatpush1.msra.mxu0 %v3392_v30  ;;  %v4835_v53 = vld [vmem:[#allocation39_spill] sm:$0xff] }
 0x3ac   :  { %1188 = vmatprep.subr.mxu1 %v3078_v55  ;;  %1259 = vmatprep.subr.mxu0 %v3402_v33  ;;  %v4836_v55 = vld [vmem:[#allocation15_spill] sm:$0xff] }
 0x3ad   :  { %1189 = vmatpush1.msra.mxu1 %v3084_v56  ;;  %1260 = vmatpush1.msra.mxu0 %v3408_v49  ;;  %v4837_v56 = vld [vmem:[#allocation40_spill] sm:$0xff] }
 0x3ae   :  { %1190 = vmatprep.subr.mxu1 %v3090_v57  ;;  %1261 = vmatprep.subr.mxu0 %v3417_v24  ;;  %v4838_v57 = vld [vmem:[#allocation16_spill] sm:$0xff] }
 0x3af   :  { %1191 = vmatpush1.msra.mxu1 %v3098_v58  ;;  %1262 = vmatpush1.msra.mxu0 %v3425_v37  ;;  %v4839_v58 = vld [vmem:[#allocation42_spill] sm:$0xff] }
 0x3b0   :  { %1192 = vmatprep.subr.mxu1 %v3110_v60  ;;  %1263 = vmatprep.subr.mxu0 %v3435_v32  ;;  %v4840_v60 = vld [vmem:[#allocation17_spill] sm:$0xff] }
 0x3b1   :  { %1193 = vmatpush1.msra.mxu1 %v3116_v61  ;;  %1264 = vmatpush1.msra.mxu0 %v3441_v54  ;;  %v4841_v61 = vld [vmem:[#allocation43_spill] sm:$0xff] }
 0x3b2   :  { %1194 = vmatprep.subr.mxu1 %v3122_v62  ;;  %1265 = vmatprep.subr.mxu0 %v3450_v0  ;;  %v4842_v62 = vld [vmem:[#allocation18_spill] sm:$0xff] }
 0x3b3   :  { %1195 = vmatpush1.msra.mxu1 %v3130_v63  ;;  %1266 = vmatpush1.msra.mxu0 %v3458_v31  ;;  %v4843_v63 = vld [vmem:[#allocation45_spill] sm:$0xff] }
 0x3b4   :  { %1196 = vmatprep.subr.mxu1 %v3142_v2  ;;  %1267 = vmatprep.subr.mxu0 %v3468_v27  ;;  %v4844_v2 = vld [vmem:[#allocation19_spill] sm:$0xff] }
 0x3b5   :  { %1197 = vmatpush1.msra.mxu1 %v3148_v3  ;;  %1268 = vmatpush1.msra.mxu0 %v3474_v59  ;;  %v4845_v3 = vmov 0.0  }
 0x3b6   :  { %1198 = vmatprep.subr.mxu1 %v3154_v4  ;;  %1269 = vmatprep.subr.mxu0 %v3483_v43  ;;  %v4846_v4 = vld [vmem:[#allocation46_spill] sm:$0xff] }
 0x3b7   :  { %1199 = vmatpush1.msra.mxu1 %v3162_v5  ;;  %1270 = vmatpush1.msra.mxu0 %v3491_v20  ;;  %v3817_v5 = vld [vmem:[%s4659_s3 + $0x248] sm:$0xff] }
 0x3b8   :  { %1200 = vmatprep.subr.mxu1 %v3174_v7  ;;  %1271 = vmatprep.subr.mxu0 %v3501_v36  ;;  %4847 = vst [vmem:[#allocation9_spill] sm:$0xff] %v3817_v5  ;;  %v4848_v7 = vld [vmem:[#allocation21_spill] sm:$0xff] }
 0x3b9   :  { %1201 = vmatpush1.msra.mxu1 %v4802_v41  ;;  %1272 = vmatpush1.msra.mxu0 %v4803_v12  ;;  %v4849_v41 = vld [vmem:[#allocation24_spill] sm:$0xff] }
 0x3ba   :  { %1202 = vmatprep.subr.mxu1 %v4804_v22  ;;  %1273 = vmatprep.subr.mxu0 %v4805_v23 }
 0x3bb   :  { %1203 = vmatpush1.msra.mxu1 %v4806_v1  ;;  %1274 = vmatpush1.msra.mxu0 %v4829_v46 }
 0x3bc   :  { %1204 = vmatprep.subr.mxu1 %v4830_v47  ;;  %1275 = vmatprep.subr.mxu0 %v4831_v48 }
 0x3bd   :  { %1205 = vmatpush1.msra.mxu1 %v4832_v50  ;;  %1276 = vmatpush1.msra.mxu0 %v4833_v51 }
 0x3be   :  { %1206 = vmatprep.subr.mxu1 %v4834_v52  ;;  %1277 = vmatprep.subr.mxu0 %v4835_v53 }
 0x3bf   :  { %1207 = vmatpush1.msra.mxu1 %v4836_v55  ;;  %1278 = vmatpush1.msra.mxu0 %v4837_v56 }
 0x3c0   :  { %1208 = vmatprep.subr.mxu1 %v4838_v57  ;;  %1279 = vmatprep.subr.mxu0 %v4839_v58 }
 0x3c1   :  { %1209 = vmatpush1.msra.mxu1 %v4840_v60  ;;  %1280 = vmatpush1.msra.mxu0 %v4841_v61 }
 0x3c2   :  { %1210 = vmatprep.subr.mxu1 %v4842_v62  ;;  %1281 = vmatprep.subr.mxu0 %v4843_v63 }
 0x3c3   :  { %1211 = vmatpush1.msra.mxu1 %v4844_v2  ;;  %1244 = vmatprep.mubr.f32.mxu1 %v4845_v3 }
 0x3c4   :  { %1282 = vmatpush1.msra.mxu0 %v4846_v4  ;;  %1315 = vmatprep.mubr.f32.mxu0 %v4845_v3 }
 0x3c5   :  { %1350 = vmatprep.subr.mxu1 %v3817_v5  ;;  %1421 = vmatprep.subr.mxu0 %v4848_v7 }
 0x464   :  { %v1076_v26 = vpop.f32.mrf.mxu1  ;;  %v1147_v9 = vpop.f32.mrf.mxu0 }
 0x465   :  { %v1152_v22 = vadd.f32 %v1076_v26, %v4849_v41  ;;  %v1154_v39 = vadd.f32 %v1147_v9, %v4852_v19  ;;  %v3832_v41 = vld [vmem:[%s4659_s3 + $0x240] sm:$0xff]  ;;  %v3993_v19 = vld [vmem:[%s4659_s3 + $0xc8] sm:$0xff] }
 0x466   :  { %v1078_v1 = vpop.f32.mrf.mxu1  ;;  %v1149_v13 = vpop.f32.mrf.mxu0  ;;  %v3958_v9 = vld [vmem:[%s4659_s3 + $0x120] sm:$0xff]  ;;  %4853 = vst [vmem:[#allocation31_spill] sm:$0xff] %v3993_v19 }
 0x467   :  { %v2372_v35 = vmul.f32 -1.442695, %v1152_v22  ;;  %v1153_v18 = vadd.f32 %v1078_v1, %v4850_v34  ;;  %v1155_v29 = vadd.f32 %v1149_v13, %v4851_v6  ;;  %v3846_v22 = vld [vmem:[%s4659_s3 + $0x220] sm:$0xff]  ;;  %v3979_v6 = vld [vmem:[%s4659_s3 + $0xe8] sm:$0xff] }
 0x468   :  { %v3930_v1 = vld [vmem:[%s4659_s3 + $0x160] sm:$0xff] }
 0x469   :  { %2704 = vpow2.f32 %v2372_v35  ;;  %v2373_v38 = vmul.f32 -1.442695, %v1153_v18  ;;  %v2374_v14 = vmul.f32 -1.442695, %v1155_v29  ;;  %v3937_v35 = vld [vmem:[%s4659_s3 + $0x148] sm:$0xff]  ;;  %v3944_v34 = vld [vmem:[%s4659_s3 + $0x140] sm:$0xff] }
 0x46a   :  { %v3951_v18 = vld [vmem:[%s4659_s3 + $0x128] sm:$0xff]  ;;  %v3972_v13 = vld [vmem:[%s4659_s3 + $0x100] sm:$0xff] }
 0x46b   :  { %2706 = vpow2.f32 %v2373_v38  ;;  %v3965_v38 = vld [vmem:[%s4659_s3 + $0x108] sm:$0xff]  ;;  %v3986_v29 = vld [vmem:[%s4659_s3 + $0xe0] sm:$0xff] }
 0x46c   :  { %2708 = vtanh.f32 %v1154_v39  ;;  %v4000_v39 = vld [vmem:[%s4659_s3 + $0xc0] sm:$0xff] }
 0x46d   :  { %2710 = vpow2.f32 %v2374_v14  ;;  %4854 = vst [vmem:[#allocation10_spill] sm:$0xff] %v4000_v39  ;;  %v4007_v14 = vld [vmem:[%s4659_s3 + $0xa8] sm:$0xff] }
 0x46e   :  { %4855 = vst [vmem:[#allocation33_spill] sm:$0xff] %v4007_v14 }
 0x476   :  { %v2705_v16 = vpop.eup %2704 }
 0x477   :  { %v1159_v8 = vadd.f32 1.0, %v2705_v16  ;;  %v4014_v16 = vld [vmem:[%s4659_s3 + $0xa0] sm:$0xff] }
 0x478   :  { %v2707_v15 = vpop.eup %2706  ;;  %4856 = vst [vmem:[#allocation11_spill] sm:$0xff] %v4014_v16 }
 0x479   :  { %2712 = vrcp.f32 %v1159_v8  ;;  %v1165_v45 = vadd.f32 1.0, %v2707_v15  ;;  %v2709_v10 = vpop.eup %2708  ;;  %v4021_v8 = vld [vmem:[%s4659_s3 + $0x88] sm:$0xff]  ;;  %v4028_v15 = vld [vmem:[%s4659_s3 + $0x80] sm:$0xff] }
 0x47a   :  { %v2711_v11 = vpop.eup %2710  ;;  %4857 = vst [vmem:[#allocation8_spill] sm:$0xff] %v4021_v8  ;;  %4858 = vst [vmem:[#allocation22_spill] sm:$0xff] %v4028_v15 }
 0x47b   :  { %2714 = vrcp.f32 %v1165_v45  ;;  %v1172_v55 = vadd.f32 1.0, %v2711_v11  ;;  %v4035_v45 = vld [vmem:[%s4659_s3 + $0x68] sm:$0xff] }
 0x47c   :  { %4859 = vst [vmem:[#allocation23_spill] sm:$0xff] %v4035_v45 }
 0x47d   :  { %2716 = vrcp.f32 %v1172_v55 }
 0x486   :  { %v2713_v47 = vpop.eup %2712 }
 0x487   :  { %v1176_v50 = vmul.f32 %v2713_v47, %v2709_v10  ;;  %v4042_v10 = vld [vmem:[%s4659_s3 + $0x60] sm:$0xff] }
 0x488   :  { %v2715_v52 = vpop.eup %2714  ;;  %4860 = vst [vmem:[#allocation34_spill] sm:$0xff] %v4042_v10  ;;  %v4861_v47 = vld [vmem:[#allocation26_spill] sm:$0xff] }
 0x489   :  { %v1175_v57 = vmul.f32 %v2715_v52, %v3747_v17  ;;  %v3839_v17 = vld [vmem:[%s4659_s3 + $0x228] sm:$0xff] }
 0x48a   :  { %v2717_v62 = vpop.eup %2716 }
 0x48b   :  { %v3826_v60 = vadd.f32 %v1176_v50, %v1175_v57  ;;  %v4862_v57 = vld [vmem:[#allocation27_spill] sm:$0xff] }
 0x48d   :  { %2718 = vtanh.f32 %v3826_v60 }
 0x49a   :  { %v2719_v2 = vpop.eup %2718 }
 0x49b   :  { %v1179_v26 = vmul.f32 %v2719_v2, %v2717_v62 }
 0x49d   :  { %1245 = vmatmul.mubr.f32.vlgmr.msra.gmra.mxu1 %v1179_v26  ;;  %1316 = vmatmul.mubr.f32.vlgmr.msra.gmra.mxu0 %v1179_v26 }
 0x49e   :  { %1351 = vmatpush1.msra.mxu1 %v3832_v41  ;;  %1422 = vmatpush1.msra.mxu0 %v3336_v40  ;;  %v3853_v40 = vld [vmem:[%s4659_s3 + $0x208] sm:$0xff] }
 0x49f   :  { %1352 = vmatprep.subr.mxu1 %v3839_v17  ;;  %1423 = vmatprep.subr.mxu0 %v3346_v42  ;;  %v3860_v42 = vld [vmem:[%s4659_s3 + $0x200] sm:$0xff] }
 0x4a0   :  { %1353 = vmatpush1.msra.mxu1 %v3846_v22  ;;  %1424 = vmatpush1.msra.mxu0 %v3354_v21  ;;  %v3867_v21 = vld [vmem:[%s4659_s3 + $0x1e8] sm:$0xff] }
 0x4a1   :  { %1354 = vmatprep.subr.mxu1 %v3853_v40  ;;  %1425 = vmatprep.subr.mxu0 %v3369_v44  ;;  %v3874_v44 = vld [vmem:[%s4659_s3 + $0x1e0] sm:$0xff] }
 0x4a2   :  { %1355 = vmatpush1.msra.mxu1 %v3860_v42  ;;  %1426 = vmatpush1.msra.mxu0 %v3375_v25  ;;  %v3881_v25 = vld [vmem:[%s4659_s3 + $0x1c8] sm:$0xff] }
 0x4a3   :  { %1356 = vmatprep.subr.mxu1 %v3867_v21  ;;  %1427 = vmatprep.subr.mxu0 %v3384_v28  ;;  %v3888_v28 = vld [vmem:[%s4659_s3 + $0x1c0] sm:$0xff] }
 0x4a4   :  { %1357 = vmatpush1.msra.mxu1 %v3874_v44  ;;  %1428 = vmatpush1.msra.mxu0 %v3392_v30  ;;  %v3895_v30 = vld [vmem:[%s4659_s3 + $0x1a8] sm:$0xff] }
 0x4a5   :  { %1358 = vmatprep.subr.mxu1 %v3881_v25  ;;  %1429 = vmatprep.subr.mxu0 %v3402_v33  ;;  %v3902_v33 = vld [vmem:[%s4659_s3 + $0x1a0] sm:$0xff] }
 0x4a6   :  { %1359 = vmatpush1.msra.mxu1 %v3888_v28  ;;  %1430 = vmatpush1.msra.mxu0 %v3408_v49  ;;  %v3909_v49 = vld [vmem:[%s4659_s3 + $0x188] sm:$0xff] }
 0x4a7   :  { %1360 = vmatprep.subr.mxu1 %v3895_v30  ;;  %1431 = vmatprep.subr.mxu0 %v3417_v24  ;;  %v3916_v24 = vld [vmem:[%s4659_s3 + $0x180] sm:$0xff] }
 0x4a8   :  { %1361 = vmatpush1.msra.mxu1 %v3902_v33  ;;  %1432 = vmatpush1.msra.mxu0 %v3425_v37  ;;  %v3923_v37 = vld [vmem:[%s4659_s3 + $0x168] sm:$0xff] }
 0x4a9   :  { %1362 = vmatprep.subr.mxu1 %v3909_v49  ;;  %1433 = vmatprep.subr.mxu0 %v3435_v32 }
 0x4aa   :  { %1363 = vmatpush1.msra.mxu1 %v3916_v24  ;;  %1434 = vmatpush1.msra.mxu0 %v3441_v54 }
 0x4ab   :  { %1364 = vmatprep.subr.mxu1 %v3923_v37  ;;  %1435 = vmatprep.subr.mxu0 %v3450_v0 }
 0x4ac   :  { %1365 = vmatpush1.msra.mxu1 %v3930_v1  ;;  %1436 = vmatpush1.msra.mxu0 %v3458_v31 }
 0x4ad   :  { %1366 = vmatprep.subr.mxu1 %v3937_v35  ;;  %1437 = vmatprep.subr.mxu0 %v3468_v27 }
 0x4ae   :  { %1367 = vmatpush1.msra.mxu1 %v3944_v34  ;;  %1438 = vmatpush1.msra.mxu0 %v3474_v59 }
 0x4af   :  { %1368 = vmatprep.subr.mxu1 %v3951_v18  ;;  %1439 = vmatprep.subr.mxu0 %v3483_v43 }
 0x4b0   :  { %1369 = vmatpush1.msra.mxu1 %v3958_v9  ;;  %1440 = vmatpush1.msra.mxu0 %v3491_v20 }
 0x4b1   :  { %1370 = vmatprep.subr.mxu1 %v3965_v38  ;;  %1441 = vmatprep.subr.mxu0 %v3501_v36 }
 0x4b2   :  { %1371 = vmatpush1.msra.mxu1 %v3972_v13  ;;  %1442 = vmatpush1.msra.mxu0 %v4803_v12 }
 0x4b3   :  { %1372 = vmatprep.subr.mxu1 %v3979_v6  ;;  %1443 = vmatprep.subr.mxu0 %v4805_v23 }
 0x4b4   :  { %1373 = vmatpush1.msra.mxu1 %v3986_v29  ;;  %1444 = vmatpush1.msra.mxu0 %v4829_v46 }
 0x4b5   :  { %1374 = vmatprep.subr.mxu1 %v3993_v19  ;;  %1445 = vmatprep.subr.mxu0 %v4831_v48 }
 0x4b6   :  { %1375 = vmatpush1.msra.mxu1 %v4000_v39  ;;  %1446 = vmatpush1.msra.mxu0 %v4833_v51 }
 0x4b7   :  { %1376 = vmatprep.subr.mxu1 %v4007_v14  ;;  %1447 = vmatprep.subr.mxu0 %v4835_v53 }
 0x4b8   :  { %1377 = vmatpush1.msra.mxu1 %v4014_v16  ;;  %1448 = vmatpush1.msra.mxu0 %v4837_v56 }
 0x4b9   :  { %1378 = vmatprep.subr.mxu1 %v4021_v8  ;;  %1449 = vmatprep.subr.mxu0 %v4839_v58 }
 0x4ba   :  { %1379 = vmatpush1.msra.mxu1 %v4028_v15  ;;  %1450 = vmatpush1.msra.mxu0 %v4841_v61 }
 0x4bb   :  { %1380 = vmatprep.subr.mxu1 %v4035_v45  ;;  %1451 = vmatprep.subr.mxu0 %v4843_v63  ;;  %v4863_v63 = vld [vmem:[#allocation51_spill] sm:$0xff]  ;;  %v4864_v45 = vld [vmem:[#allocation50_spill] sm:$0xff] }
 0x4bc   :  { %1381 = vmatpush1.msra.mxu1 %v4042_v10  ;;  %1414 = vmatprep.mubr.f32.mxu1 %v4845_v3 }
 0x4bd   :  { %1452 = vmatpush1.msra.mxu0 %v4846_v4  ;;  %1485 = vmatprep.mubr.f32.mxu0 %v4845_v3 }
 0x4be   :  { %1520 = vmatprep.subr.mxu1 %v3817_v5  ;;  %1591 = vmatprep.subr.mxu0 %v4848_v7 }
 0x55d   :  { %v1246_v11 = vpop.f32.mrf.mxu1  ;;  %v1317_v2 = vpop.f32.mrf.mxu0 }
 0x55e   :  { %v1322_v50 = vadd.f32 %v1246_v11, %v4861_v47  ;;  %v1324_v3 = vadd.f32 %v1317_v2, %v4864_v45  ;;  %v4083_v45 = vld [vmem:[%s4659_s3 + $0x218] sm:$0xff] }
 0x55f   :  { %v1248_v52 = vpop.f32.mrf.mxu1  ;;  %v1319_v10 = vpop.f32.mrf.mxu0  ;;  %v4097_v2 = vld [vmem:[%s4659_s3 + $0x1f8] sm:$0xff] }
 0x560   :  { %v2375_v55 = vmul.f32 -1.442695, %v1322_v50  ;;  %v1323_v62 = vadd.f32 %v1248_v52, %v4862_v57  ;;  %v1325_v4 = vadd.f32 %v1319_v10, %v4863_v63  ;;  %v4090_v10 = vld [vmem:[%s4659_s3 + $0x210] sm:$0xff] }
 0x562   :  { %2720 = vpow2.f32 %v2375_v55  ;;  %v2376_v26 = vmul.f32 -1.442695, %v1323_v62  ;;  %v2377_v61 = vmul.f32 -1.442695, %v1325_v4 }
 0x564   :  { %2722 = vpow2.f32 %v2376_v26 }
 0x565   :  { %2724 = vtanh.f32 %v1324_v3 }
 0x566   :  { %2726 = vpow2.f32 %v2377_v61  ;;  %v4062_v61 = vld [vmem:[%s4659_s3 + $0x250] sm:$0xff] }
 0x56f   :  { %v2721_v5 = vpop.eup %2720 }
 0x570   :  { %v1329_v15 = vadd.f32 1.0, %v2721_v5 }
 0x571   :  { %v2723_v7 = vpop.eup %2722 }
 0x572   :  { %2728 = vrcp.f32 %v1329_v15  ;;  %v1335_v11 = vadd.f32 1.0, %v2723_v7  ;;  %v2725_v47 = vpop.eup %2724  ;;  %v4076_v15 = vld [vmem:[%s4659_s3 + $0x230] sm:$0xff] }
 0x573   :  { %v2727_v50 = vpop.eup %2726  ;;  %v4104_v7 = vld [vmem:[%s4659_s3 + $0x1f0] sm:$0xff] }
 0x574   :  { %2730 = vrcp.f32 %v1335_v11  ;;  %v1342_v62 = vadd.f32 1.0, %v2727_v50  ;;  %v4111_v11 = vld [vmem:[%s4659_s3 + $0x1d8] sm:$0xff] }
 0x575   :  { %v4125_v50 = vld [vmem:[%s4659_s3 + $0x1b8] sm:$0xff] }
 0x576   :  { %2732 = vrcp.f32 %v1342_v62  ;;  %v4875_v62 = vld [vmem:[#allocation53_spill] sm:$0xff] }
 0x57f   :  { %v2729_v52 = vpop.eup %2728 }
 0x580   :  { %v1346_v55 = vmul.f32 %v2729_v52, %v2725_v47  ;;  %v4118_v47 = vld [vmem:[%s4659_s3 + $0x1d0] sm:$0xff] }
 0x581   :  { %v2731_v57 = vpop.eup %2730  ;;  %v4132_v52 = vld [vmem:[%s4659_s3 + $0x1b0] sm:$0xff] }
 0x582   :  { %v1345_v26 = vmul.f32 %v2731_v57, %v3826_v60  ;;  %v4069_v60 = vld [vmem:[%s4659_s3 + $0x238] sm:$0xff] }
 0x583   :  { %v2733_v4 = vpop.eup %2732 }
 0x584   :  { %v4055_v63 = vadd.f32 %v1346_v55, %v1345_v26 }
 0x586   :  { %2734 = vtanh.f32 %v4055_v63 }
 0x593   :  { %v2735_v3 = vpop.eup %2734 }
 0x594   :  { %v1349_v5 = vmul.f32 %v2735_v3, %v2733_v4  ;;  %v4876_v4 = vld [vmem:[#allocation52_spill] sm:$0xff] }
 0x596   :  { %1415 = vmatmul.mubr.f32.vlgmr.msra.gmra.mxu1 %v1349_v5  ;;  %1486 = vmatmul.mubr.f32.vlgmr.msra.gmra.mxu0 %v1349_v5 }
 0x597   :  { %1521 = vmatpush1.msra.mxu1 %v3832_v41  ;;  %1592 = vmatpush1.msra.mxu0 %v4062_v61 }
 0x598   :  { %1522 = vmatprep.subr.mxu1 %v3839_v17  ;;  %1593 = vmatprep.subr.mxu0 %v4069_v60 }
 0x599   :  { %1523 = vmatpush1.msra.mxu1 %v3846_v22  ;;  %1594 = vmatpush1.msra.mxu0 %v4076_v15 }
 0x59a   :  { %1524 = vmatprep.subr.mxu1 %v3853_v40  ;;  %1595 = vmatprep.subr.mxu0 %v4083_v45 }
 0x59b   :  { %1525 = vmatpush1.msra.mxu1 %v3860_v42  ;;  %1596 = vmatpush1.msra.mxu0 %v4090_v10 }
 0x59c   :  { %1526 = vmatprep.subr.mxu1 %v3867_v21  ;;  %1597 = vmatprep.subr.mxu0 %v4097_v2 }
 0x59d   :  { %1527 = vmatpush1.msra.mxu1 %v3874_v44  ;;  %1598 = vmatpush1.msra.mxu0 %v4104_v7 }
 0x59e   :  { %1528 = vmatprep.subr.mxu1 %v3881_v25  ;;  %1599 = vmatprep.subr.mxu0 %v4111_v11 }
 0x59f   :  { %1529 = vmatpush1.msra.mxu1 %v3888_v28  ;;  %1600 = vmatpush1.msra.mxu0 %v4118_v47 }
 0x5a0   :  { %1530 = vmatprep.subr.mxu1 %v3895_v30  ;;  %1601 = vmatprep.subr.mxu0 %v4125_v50 }
 0x5a1   :  { %1531 = vmatpush1.msra.mxu1 %v3902_v33  ;;  %1602 = vmatpush1.msra.mxu0 %v4132_v52 }
 0x5a2   :  { %1532 = vmatprep.subr.mxu1 %v3909_v49  ;;  %1603 = vmatprep.subr.mxu0 %v3435_v32  ;;  %v4867_v32 = vld [vmem:[#allocation23_spill] sm:$0xff] }
 0x5a3   :  { %1533 = vmatpush1.msra.mxu1 %v3916_v24  ;;  %1604 = vmatpush1.msra.mxu0 %v3441_v54  ;;  %v4870_v54 = vmov 0.0  }
 0x5a4   :  { %1534 = vmatprep.subr.mxu1 %v3923_v37  ;;  %1605 = vmatprep.subr.mxu0 %v3450_v0  ;;  %v4865_v0 = vld [vmem:[#allocation22_spill] sm:$0xff] }
 0x5a5   :  { %1535 = vmatpush1.msra.mxu1 %v3930_v1  ;;  %1606 = vmatpush1.msra.mxu0 %v3458_v31  ;;  %v4869_v31 = vld [vmem:[#allocation34_spill] sm:$0xff] }
 0x5a6   :  { %1536 = vmatprep.subr.mxu1 %v3937_v35  ;;  %1607 = vmatprep.subr.mxu0 %v3468_v27  ;;  %v4868_v27 = vld [vmem:[#allocation45_spill] sm:$0xff] }
 0x5a7   :  { %1537 = vmatpush1.msra.mxu1 %v3944_v34  ;;  %1608 = vmatpush1.msra.mxu0 %v3474_v59  ;;  %v4872_v59 = vld [vmem:[#allocation9_spill] sm:$0xff] }
 0x5a8   :  { %1538 = vmatprep.subr.mxu1 %v3951_v18  ;;  %1609 = vmatprep.subr.mxu0 %v3483_v43  ;;  %v4871_v43 = vld [vmem:[#allocation46_spill] sm:$0xff] }
 0x5a9   :  { %1539 = vmatpush1.msra.mxu1 %v3958_v9  ;;  %1610 = vmatpush1.msra.mxu0 %v3491_v20  ;;  %v4866_v20 = vld [vmem:[#allocation43_spill] sm:$0xff] }
 0x5aa   :  { %1540 = vmatprep.subr.mxu1 %v3965_v38  ;;  %1611 = vmatprep.subr.mxu0 %v3501_v36  ;;  %v4181_v36 = vld [vmem:[%s4659_s3 + $0x258] sm:$0xff] }
 0x5ab   :  { %1541 = vmatpush1.msra.mxu1 %v3972_v13  ;;  %1612 = vmatpush1.msra.mxu0 %v4803_v12 }
 0x5ac   :  { %1542 = vmatprep.subr.mxu1 %v3979_v6  ;;  %1613 = vmatprep.subr.mxu0 %v4805_v23  ;;  %v4873_v23 = vld [vmem:[#allocation28_spill] sm:$0xff] }
 0x5ad   :  { %1543 = vmatpush1.msra.mxu1 %v3986_v29  ;;  %1614 = vmatpush1.msra.mxu0 %v4829_v46 }
 0x5ae   :  { %1544 = vmatprep.subr.mxu1 %v3993_v19  ;;  %1615 = vmatprep.subr.mxu0 %v4831_v48 }
 0x5af   :  { %1545 = vmatpush1.msra.mxu1 %v4000_v39  ;;  %1616 = vmatpush1.msra.mxu0 %v4833_v51 }
 0x5b0   :  { %1546 = vmatprep.subr.mxu1 %v4007_v14  ;;  %1617 = vmatprep.subr.mxu0 %v4835_v53  ;;  %v4874_v53 = vld [vmem:[#allocation29_spill] sm:$0xff] }
 0x5b1   :  { %1547 = vmatpush1.msra.mxu1 %v4014_v16  ;;  %1618 = vmatpush1.msra.mxu0 %v4837_v56 }
 0x5b2   :  { %1548 = vmatprep.subr.mxu1 %v4021_v8  ;;  %1619 = vmatprep.subr.mxu0 %v4839_v58 }
 0x5b3   :  { %1549 = vmatpush1.msra.mxu1 %v4865_v0  ;;  %1620 = vmatpush1.msra.mxu0 %v4866_v20 }
 0x5b4   :  { %1550 = vmatprep.subr.mxu1 %v4867_v32  ;;  %1621 = vmatprep.subr.mxu0 %v4868_v27 }
 0x5b5   :  { %1551 = vmatpush1.msra.mxu1 %v4869_v31  ;;  %1584 = vmatprep.mubr.f32.mxu1 %v4870_v54 }
 0x5b6   :  { %1622 = vmatpush1.msra.mxu0 %v4871_v43  ;;  %1655 = vmatprep.mubr.f32.mxu0 %v4870_v54 }
 0x5b7   :  { %1690 = vmatprep.subr.mxu1 %v4872_v59  ;;  %1761 = vmatprep.subr.mxu0 %v4181_v36 }
 0x656   :  { %v1416_v12 = vpop.f32.mrf.mxu1  ;;  %v1487_v58 = vpop.f32.mrf.mxu0 }
 0x657   :  { %v1492_v46 = vadd.f32 %v1416_v12, %v4873_v23  ;;  %v1494_v3 = vadd.f32 %v1487_v58, %v4876_v4  ;;  %v4225_v4 = vld [vmem:[%s4659_s3 + $0x190] sm:$0xff] }
 0x658   :  { %v1418_v48 = vpop.f32.mrf.mxu1  ;;  %v1489_v57 = vpop.f32.mrf.mxu0 }
 0x659   :  { %v2378_v51 = vmul.f32 -1.442695, %v1492_v46  ;;  %v1493_v56 = vadd.f32 %v1418_v48, %v4874_v53  ;;  %v1495_v26 = vadd.f32 %v1489_v57, %v4875_v62 }
 0x65b   :  { %2736 = vpow2.f32 %v2378_v51  ;;  %v2379_v55 = vmul.f32 -1.442695, %v1493_v56  ;;  %v2380_v5 = vmul.f32 -1.442695, %v1495_v26 }
 0x65d   :  { %2738 = vpow2.f32 %v2379_v55 }
 0x65e   :  { %2740 = vtanh.f32 %v1494_v3  ;;  %v4232_v3 = vld [vmem:[%s4659_s3 + $0x178] sm:$0xff] }
 0x65f   :  { %2742 = vpow2.f32 %v2380_v5  ;;  %v4239_v5 = vld [vmem:[%s4659_s3 + $0x170] sm:$0xff] }
 0x668   :  { %v2737_v20 = vpop.eup %2736 }
 0x669   :  { %v1499_v27 = vadd.f32 1.0, %v2737_v20  ;;  %v4246_v20 = vld [vmem:[%s4659_s3 + $0x158] sm:$0xff] }
 0x66a   :  { %v2739_v43 = vpop.eup %2738 }
 0x66b   :  { %2744 = vrcp.f32 %v1499_v27  ;;  %v1505_v12 = vadd.f32 1.0, %v2739_v43  ;;  %v2741_v23 = vpop.eup %2740  ;;  %v4253_v27 = vld [vmem:[%s4659_s3 + $0x150] sm:$0xff]  ;;  %v4260_v43 = vld [vmem:[%s4659_s3 + $0x138] sm:$0xff] }
 0x66c   :  { %v2743_v46 = vpop.eup %2742 }
 0x66d   :  { %2746 = vrcp.f32 %v1505_v12  ;;  %v1512_v56 = vadd.f32 1.0, %v2743_v46  ;;  %v4267_v12 = vld [vmem:[%s4659_s3 + $0x130] sm:$0xff] }
 0x66e   :  { %v4281_v46 = vld [vmem:[%s4659_s3 + $0x110] sm:$0xff] }
 0x66f   :  { %2748 = vrcp.f32 %v1512_v56  ;;  %v4309_v56 = vld [vmem:[%s4659_s3 + $0xd0] sm:$0xff] }
 0x670   :  { %4879 = vst [vmem:[#allocation13_spill] sm:$0xff] %v4309_v56 }
 0x678   :  { %v2745_v48 = vpop.eup %2744 }
 0x679   :  { %v1516_v51 = vmul.f32 %v2745_v48, %v2741_v23  ;;  %v4274_v23 = vld [vmem:[%s4659_s3 + $0x118] sm:$0xff] }
 0x67a   :  { %v2747_v53 = vpop.eup %2746  ;;  %v4288_v48 = vld [vmem:[%s4659_s3 + $0xf8] sm:$0xff] }
 0x67b   :  { %v1515_v55 = vmul.f32 %v2747_v53, %v4055_v63  ;;  %v4218_v63 = vld [vmem:[%s4659_s3 + $0x198] sm:$0xff] }
 0x67c   :  { %v2749_v58 = vpop.eup %2748  ;;  %v4302_v53 = vld [vmem:[%s4659_s3 + $0xd8] sm:$0xff] }
 0x67d   :  { %v4189_v57 = vadd.f32 %v1516_v51, %v1515_v55  ;;  %v4295_v51 = vld [vmem:[%s4659_s3 + $0xf0] sm:$0xff]  ;;  %4878 = vst [vmem:[#allocation36_spill] sm:$0xff] %v4302_v53  ;;  %v4316_v55 = vld [vmem:[%s4659_s3 + $0xb8] sm:$0xff] }
 0x67e   :  { %4877 = vst [vmem:[#allocation12_spill] sm:$0xff] %v4295_v51  ;;  %4880 = vst [vmem:[#allocation37_spill] sm:$0xff] %v4316_v55 }
 0x67f   :  { %2750 = vtanh.f32 %v4189_v57 }
 0x68c   :  { %v2751_v62 = vpop.eup %2750 }
 0x68d   :  { %v1519_v26 = vmul.f32 %v2751_v62, %v2749_v58  ;;  %v4323_v58 = vld [vmem:[%s4659_s3 + $0xb0] sm:$0xff]  ;;  %v4330_v62 = vld [vmem:[%s4659_s3 + $0x98] sm:$0xff] }
 0x68e   :  { %4881 = vst [vmem:[#allocation14_spill] sm:$0xff] %v4323_v58  ;;  %4882 = vst [vmem:[#allocation39_spill] sm:$0xff] %v4330_v62 }
 0x68f   :  { %1585 = vmatmul.mubr.f32.vlgmr.msra.gmra.mxu1 %v1519_v26  ;;  %1656 = vmatmul.mubr.f32.vlgmr.msra.gmra.mxu0 %v1519_v26  ;;  %v4337_v26 = vld [vmem:[%s4659_s3 + $0x90] sm:$0xff] }
 0x690   :  { %1691 = vmatpush1.msra.mxu1 %v3832_v41  ;;  %1762 = vmatpush1.msra.mxu0 %v4062_v61  ;;  %4883 = vst [vmem:[#allocation15_spill] sm:$0xff] %v4337_v26 }
 0x691   :  { %1692 = vmatprep.subr.mxu1 %v3839_v17  ;;  %1763 = vmatprep.subr.mxu0 %v4069_v60 }
 0x692   :  { %1693 = vmatpush1.msra.mxu1 %v3846_v22  ;;  %1764 = vmatpush1.msra.mxu0 %v4076_v15 }
 0x693   :  { %1694 = vmatprep.subr.mxu1 %v3853_v40  ;;  %1765 = vmatprep.subr.mxu0 %v4083_v45 }
 0x694   :  { %1695 = vmatpush1.msra.mxu1 %v3860_v42  ;;  %1766 = vmatpush1.msra.mxu0 %v4090_v10 }
 0x695   :  { %1696 = vmatprep.subr.mxu1 %v3867_v21  ;;  %1767 = vmatprep.subr.mxu0 %v4097_v2 }
 0x696   :  { %1697 = vmatpush1.msra.mxu1 %v3874_v44  ;;  %1768 = vmatpush1.msra.mxu0 %v4104_v7 }
 0x697   :  { %1698 = vmatprep.subr.mxu1 %v3881_v25  ;;  %1769 = vmatprep.subr.mxu0 %v4111_v11 }
 0x698   :  { %1699 = vmatpush1.msra.mxu1 %v3888_v28  ;;  %1770 = vmatpush1.msra.mxu0 %v4118_v47 }
 0x699   :  { %1700 = vmatprep.subr.mxu1 %v3895_v30  ;;  %1771 = vmatprep.subr.mxu0 %v4125_v50 }
 0x69a   :  { %1701 = vmatpush1.msra.mxu1 %v3902_v33  ;;  %1772 = vmatpush1.msra.mxu0 %v4132_v52 }
 0x69b   :  { %1702 = vmatprep.subr.mxu1 %v3909_v49  ;;  %1773 = vmatprep.subr.mxu0 %v4218_v63 }
 0x69c   :  { %1703 = vmatpush1.msra.mxu1 %v3916_v24  ;;  %1774 = vmatpush1.msra.mxu0 %v4225_v4 }
 0x69d   :  { %1704 = vmatprep.subr.mxu1 %v3923_v37  ;;  %1775 = vmatprep.subr.mxu0 %v4232_v3 }
 0x69e   :  { %1705 = vmatpush1.msra.mxu1 %v3930_v1  ;;  %1776 = vmatpush1.msra.mxu0 %v4239_v5 }
 0x69f   :  { %1706 = vmatprep.subr.mxu1 %v3937_v35  ;;  %1777 = vmatprep.subr.mxu0 %v4246_v20 }
 0x6a0   :  { %1707 = vmatpush1.msra.mxu1 %v3944_v34  ;;  %1778 = vmatpush1.msra.mxu0 %v4253_v27 }
 0x6a1   :  { %1708 = vmatprep.subr.mxu1 %v3951_v18  ;;  %1779 = vmatprep.subr.mxu0 %v4260_v43 }
 0x6a2   :  { %1709 = vmatpush1.msra.mxu1 %v3958_v9  ;;  %1780 = vmatpush1.msra.mxu0 %v4267_v12 }
 0x6a3   :  { %1710 = vmatprep.subr.mxu1 %v3965_v38  ;;  %1781 = vmatprep.subr.mxu0 %v4274_v23 }
 0x6a4   :  { %1711 = vmatpush1.msra.mxu1 %v3972_v13  ;;  %1782 = vmatpush1.msra.mxu0 %v4281_v46 }
 0x6a5   :  { %1712 = vmatprep.subr.mxu1 %v3979_v6  ;;  %1783 = vmatprep.subr.mxu0 %v4288_v48 }
 0x6a6   :  { %1713 = vmatpush1.msra.mxu1 %v3986_v29  ;;  %1784 = vmatpush1.msra.mxu0 %v4295_v51 }
 0x6a7   :  { %1714 = vmatprep.subr.mxu1 %v3993_v19  ;;  %1785 = vmatprep.subr.mxu0 %v4302_v53  ;;  %v4889_v53 = vld [vmem:[#allocation54_spill] sm:$0xff] }
 0x6a8   :  { %1715 = vmatpush1.msra.mxu1 %v4000_v39  ;;  %1786 = vmatpush1.msra.mxu0 %v4309_v56  ;;  %v4888_v39 = vld [vmem:[#allocation55_spill] sm:$0xff] }
 0x6a9   :  { %1716 = vmatprep.subr.mxu1 %v4007_v14  ;;  %1787 = vmatprep.subr.mxu0 %v4316_v55 }
 0x6aa   :  { %1717 = vmatpush1.msra.mxu1 %v4014_v16  ;;  %1788 = vmatpush1.msra.mxu0 %v4323_v58  ;;  %v4887_v58 = vld [vmem:[#allocation32_spill] sm:$0xff] }
 0x6ab   :  { %1718 = vmatprep.subr.mxu1 %v4021_v8  ;;  %1789 = vmatprep.subr.mxu0 %v4330_v62  ;;  %v4344_v8 = vld [vmem:[%s4659_s3 + $0x78] sm:$0xff] }
 0x6ac   :  { %1719 = vmatpush1.msra.mxu1 %v4865_v0  ;;  %1790 = vmatpush1.msra.mxu0 %v4337_v26  ;;  %4884 = vst [vmem:[#allocation40_spill] sm:$0xff] %v4344_v8  ;;  %v4352_v0 = vld [vmem:[%s4659_s3 + $0x70] sm:$0xff]  ;;  %v4886_v26 = vld [vmem:[#allocation30_spill] sm:$0xff] }
 0x6ad   :  { %1720 = vmatprep.subr.mxu1 %v4867_v32  ;;  %1791 = vmatprep.subr.mxu0 %v4344_v8  ;;  %4885 = vst [vmem:[#allocation16_spill] sm:$0xff] %v4352_v0 }
 0x6ae   :  { %1721 = vmatpush1.msra.mxu1 %v4869_v31  ;;  %1754 = vmatprep.mubr.f32.mxu1 %v4870_v54 }
 0x6af   :  { %1792 = vmatpush1.msra.mxu0 %v4352_v0  ;;  %1825 = vmatprep.mubr.f32.mxu0 %v4870_v54 }
 0x6b0   :  { %1860 = vmatprep.subr.mxu1 %v4872_v59  ;;  %1931 = vmatprep.subr.mxu0 %v4181_v36 }
 0x74f   :  { %v1586_v32 = vpop.f32.mrf.mxu1  ;;  %v1657_v55 = vpop.f32.mrf.mxu0 }
 0x750   :  { %v1662_v8 = vadd.f32 %v1586_v32, %v4886_v26  ;;  %v1664_v54 = vadd.f32 %v1657_v55, %v4889_v53  ;;  %v2061_v55 = vld [vmem:[%s4660_s4 + $0xf8] sm:$0xff] }
 0x751   :  { %v1588_v62 = vpop.f32.mrf.mxu1  ;;  %v1659_v56 = vpop.f32.mrf.mxu0 }
 0x752   :  { %v2381_v31 = vmul.f32 -1.442695, %v1662_v8  ;;  %v1663_v16 = vadd.f32 %v1588_v62, %v4887_v58  ;;  %v1665_v0 = vadd.f32 %v1659_v56, %v4888_v39  ;;  %v2045_v56 = vld [vmem:[%s4660_s4 + $0x78] sm:$0xff] }
 0x754   :  { %2752 = vpow2.f32 %v2381_v31  ;;  %v2382_v14 = vmul.f32 -1.442695, %v1663_v16  ;;  %v2383_v19 = vmul.f32 -1.442695, %v1665_v0 }
 0x756   :  { %2754 = vpow2.f32 %v2382_v14 }
 0x757   :  { %2756 = vtanh.f32 %v1664_v54 }
 0x758   :  { %2758 = vpow2.f32 %v2383_v19  ;;  %v4909_v19 = vld [vmem:[#allocation38_spill] sm:$0xff] }
 0x761   :  { %v2753_v59 = vpop.eup %2752 }
 0x762   :  { %v1669_v51 = vadd.f32 1.0, %v2753_v59  ;;  %v2044_v59 = vld [vmem:[%s4660_s4 + $0x70] sm:$0xff] }
 0x763   :  { %v2755_v36 = vpop.eup %2754 }
 0x764   :  { %2760 = vrcp.f32 %v1669_v51  ;;  %v1675_v32 = vadd.f32 1.0, %v2755_v36  ;;  %v2757_v8 = vpop.eup %2756  ;;  %v2060_v36 = vld [vmem:[%s4660_s4 + $0xf0] sm:$0xff] }
 0x765   :  { %v2759_v58 = vpop.eup %2758 }
 0x766   :  { %2762 = vrcp.f32 %v1675_v32  ;;  %v1682_v14 = vadd.f32 1.0, %v2759_v58  ;;  %v2043_v32 = vld [vmem:[%s4660_s4 + $0x68] sm:$0xff]  ;;  %v2042_v58 = vld [vmem:[%s4660_s4 + $0x60] sm:$0xff] }
 0x768   :  { %2764 = vrcp.f32 %v1682_v14  ;;  %v2040_v14 = vld [vmem:[%s4660_s4 + $0x50] sm:$0xff] }
 0x771   :  { %v2761_v31 = vpop.eup %2760 }
 0x772   :  { %v1686_v62 = vmul.f32 %v2761_v31, %v2757_v8  ;;  %v2059_v8 = vld [vmem:[%s4660_s4 + $0xe8] sm:$0xff]  ;;  %v2058_v31 = vld [vmem:[%s4660_s4 + $0xe0] sm:$0xff] }
 0x773   :  { %v2763_v16 = vpop.eup %2762 }
 0x774   :  { %v1685_v26 = vmul.f32 %v2763_v16, %v4189_v57  ;;  %v2057_v16 = vld [vmem:[%s4660_s4 + $0xd8] sm:$0xff] }
 0x775   :  { %v2765_v0 = vpop.eup %2764 }
 0x776   :  { %v4363_v39 = vadd.f32 %v1686_v62, %v1685_v26  ;;  %v2041_v62 = vld [vmem:[%s4660_s4 + $0x58] sm:$0xff]  ;;  %v2056_v26 = vld [vmem:[%s4660_s4 + $0xd0] sm:$0xff] }
 0x778   :  { %2766 = vtanh.f32 %v4363_v39 }
 0x785   :  { %v2767_v54 = vpop.eup %2766 }
 0x786   :  { %v1689_v53 = vmul.f32 %v2767_v54, %v2765_v0  ;;  %v2055_v0 = vld [vmem:[%s4660_s4 + $0xc8] sm:$0xff]  ;;  %v2038_v54 = vld [vmem:[%s4660_s4 + $0x40] sm:$0xff] }
 0x788   :  { %1755 = vmatmul.mubr.f32.vlgmr.msra.gmra.mxu1 %v1689_v53  ;;  %1826 = vmatmul.mubr.f32.vlgmr.msra.gmra.mxu0 %v1689_v53  ;;  %v2054_v53 = vld [vmem:[%s4660_s4 + $0xc0] sm:$0xff] }
 0x789   :  { %1861 = vmatpush1.msra.mxu1 %v3832_v41  ;;  %1932 = vmatpush1.msra.mxu0 %v4062_v61  ;;  %v4890_v41 = vld [vmem:[#allocation12_spill] sm:$0xff] }
 0x78a   :  { %1862 = vmatprep.subr.mxu1 %v3839_v17  ;;  %1933 = vmatprep.subr.mxu0 %v4069_v60  ;;  %v4891_v17 = vld [vmem:[#allocation31_spill] sm:$0xff] }
 0x78b   :  { %1863 = vmatpush1.msra.mxu1 %v3846_v22  ;;  %1934 = vmatpush1.msra.mxu0 %v4076_v15  ;;  %v4892_v22 = vld [vmem:[#allocation36_spill] sm:$0xff] }
 0x78c   :  { %1864 = vmatprep.subr.mxu1 %v3853_v40  ;;  %1935 = vmatprep.subr.mxu0 %v4083_v45  ;;  %v4893_v40 = vld [vmem:[#allocation10_spill] sm:$0xff] }
 0x78d   :  { %1865 = vmatpush1.msra.mxu1 %v3860_v42  ;;  %1936 = vmatpush1.msra.mxu0 %v4090_v10  ;;  %v4894_v42 = vld [vmem:[#allocation13_spill] sm:$0xff] }
 0x78e   :  { %1866 = vmatprep.subr.mxu1 %v3867_v21  ;;  %1937 = vmatprep.subr.mxu0 %v4097_v2  ;;  %v4895_v21 = vld [vmem:[#allocation33_spill] sm:$0xff] }
 0x78f   :  { %1867 = vmatpush1.msra.mxu1 %v3874_v44  ;;  %1938 = vmatpush1.msra.mxu0 %v4104_v7  ;;  %v4896_v44 = vld [vmem:[#allocation37_spill] sm:$0xff]  ;;  %v4911_v7 = vld [vmem:[#allocation56_spill] sm:$0xff] }
 0x790   :  { %1868 = vmatprep.subr.mxu1 %v3881_v25  ;;  %1939 = vmatprep.subr.mxu0 %v4111_v11  ;;  %v4897_v25 = vld [vmem:[#allocation11_spill] sm:$0xff]  ;;  %v4910_v10 = vld [vmem:[#allocation57_spill] sm:$0xff] }
 0x791   :  { %1869 = vmatpush1.msra.mxu1 %v3888_v28  ;;  %1940 = vmatpush1.msra.mxu0 %v4118_v47  ;;  %v4898_v28 = vld [vmem:[#allocation14_spill] sm:$0xff] }
 0x792   :  { %1870 = vmatprep.subr.mxu1 %v3895_v30  ;;  %1941 = vmatprep.subr.mxu0 %v4125_v50  ;;  %v4899_v30 = vld [vmem:[#allocation8_spill] sm:$0xff] }
 0x793   :  { %1871 = vmatpush1.msra.mxu1 %v3902_v33  ;;  %1942 = vmatpush1.msra.mxu0 %v4132_v52  ;;  %v4900_v33 = vld [vmem:[#allocation39_spill] sm:$0xff] }
 0x794   :  { %1872 = vmatprep.subr.mxu1 %v3909_v49  ;;  %1943 = vmatprep.subr.mxu0 %v4218_v63  ;;  %v4901_v49 = vld [vmem:[#allocation22_spill] sm:$0xff] }
 0x795   :  { %1873 = vmatpush1.msra.mxu1 %v3916_v24  ;;  %1944 = vmatpush1.msra.mxu0 %v4225_v4  ;;  %v4902_v24 = vld [vmem:[#allocation15_spill] sm:$0xff] }
 0x796   :  { %1874 = vmatprep.subr.mxu1 %v3923_v37  ;;  %1945 = vmatprep.subr.mxu0 %v4232_v3  ;;  %v4903_v37 = vld [vmem:[#allocation23_spill] sm:$0xff] }
 0x797   :  { %1875 = vmatpush1.msra.mxu1 %v3930_v1  ;;  %1946 = vmatpush1.msra.mxu0 %v4239_v5  ;;  %v4904_v1 = vld [vmem:[#allocation40_spill] sm:$0xff] }
 0x798   :  { %1876 = vmatprep.subr.mxu1 %v3937_v35  ;;  %1947 = vmatprep.subr.mxu0 %v4246_v20  ;;  %v4905_v35 = vld [vmem:[#allocation34_spill] sm:$0xff] }
 0x799   :  { %1877 = vmatpush1.msra.mxu1 %v3944_v34  ;;  %1948 = vmatpush1.msra.mxu0 %v4253_v27  ;;  %v4906_v34 = vld [vmem:[#allocation16_spill] sm:$0xff] }
 0x79a   :  { %1878 = vmatprep.subr.mxu1 %v3951_v18  ;;  %1949 = vmatprep.subr.mxu0 %v4260_v43  ;;  %v4907_v18 = vmov 0.0  }
 0x79b   :  { %1879 = vmatpush1.msra.mxu1 %v3958_v9  ;;  %1950 = vmatpush1.msra.mxu0 %v4267_v12 }
 0x79c   :  { %1880 = vmatprep.subr.mxu1 %v3965_v38  ;;  %1951 = vmatprep.subr.mxu0 %v4274_v23  ;;  %v4908_v38 = vld [vmem:[#allocation35_spill] sm:$0xff] }
 0x79d   :  { %1881 = vmatpush1.msra.mxu1 %v3972_v13  ;;  %1952 = vmatpush1.msra.mxu0 %v4281_v46 }
 0x79e   :  { %1882 = vmatprep.subr.mxu1 %v3979_v6  ;;  %1953 = vmatprep.subr.mxu0 %v4288_v48 }
 0x79f   :  { %1883 = vmatpush1.msra.mxu1 %v3986_v29  ;;  %1954 = vmatpush1.msra.mxu0 %v4890_v41  ;;  %v2037_v41 = vld [vmem:[%s4660_s4 + $0x38] sm:$0xff] }
 0x7a0   :  { %1884 = vmatprep.subr.mxu1 %v4891_v17  ;;  %1955 = vmatprep.subr.mxu0 %v4892_v22  ;;  %v2053_v17 = vld [vmem:[%s4660_s4 + $0xb8] sm:$0xff]  ;;  %v2036_v22 = vld [vmem:[%s4660_s4 + $0x30] sm:$0xff] }
 0x7a1   :  { %1885 = vmatpush1.msra.mxu1 %v4893_v40  ;;  %1956 = vmatpush1.msra.mxu0 %v4894_v42  ;;  %v2052_v40 = vld [vmem:[%s4660_s4 + $0xb0] sm:$0xff]  ;;  %v2035_v42 = vld [vmem:[%s4660_s4 + $0x28] sm:$0xff] }
 0x7a2   :  { %1886 = vmatprep.subr.mxu1 %v4895_v21  ;;  %1957 = vmatprep.subr.mxu0 %v4896_v44  ;;  %v2051_v21 = vld [vmem:[%s4660_s4 + $0xa8] sm:$0xff]  ;;  %v2034_v44 = vld [vmem:[%s4660_s4 + $0x20] sm:$0xff] }
 0x7a3   :  { %1887 = vmatpush1.msra.mxu1 %v4897_v25  ;;  %1958 = vmatpush1.msra.mxu0 %v4898_v28  ;;  %v2050_v25 = vld [vmem:[%s4660_s4 + $0xa0] sm:$0xff]  ;;  %v2033_v28 = vld [vmem:[%s4660_s4 + $0x18] sm:$0xff] }
 0x7a4   :  { %1888 = vmatprep.subr.mxu1 %v4899_v30  ;;  %1959 = vmatprep.subr.mxu0 %v4900_v33  ;;  %v2049_v30 = vld [vmem:[%s4660_s4 + $0x98] sm:$0xff]  ;;  %v2344_v33 = vld [vmem:[#allocation2 + $0x128] ss:$0 sm:$0xff] }
 0x7a5   :  { %1889 = vmatpush1.msra.mxu1 %v4901_v49  ;;  %1960 = vmatpush1.msra.mxu0 %v4902_v24  ;;  %v2032_v49 = vld [vmem:[%s4660_s4 + $0x10] sm:$0xff] }
 0x7a6   :  { %1890 = vmatprep.subr.mxu1 %v4903_v37  ;;  %1961 = vmatprep.subr.mxu0 %v4904_v1  ;;  %v2048_v24 = vld [vmem:[%s4660_s4 + $0x90] sm:$0xff]  ;;  %v2031_v37 = vld [vmem:[%s4660_s4 + $0x8] sm:$0xff] }
 0x7a7   :  { %1891 = vmatpush1.msra.mxu1 %v4905_v35  ;;  %1962 = vmatpush1.msra.mxu0 %v4906_v34  ;;  %v2047_v1 = vld [vmem:[%s4660_s4 + $0x88] sm:$0xff] }
 0x7a8   :  { %1924 = vmatprep.mubr.f32.mxu1 %v4907_v18  ;;  %1995 = vmatprep.mubr.f32.mxu0 %v4907_v18  ;;  %v4912_v35 = vld [vmem:[#allocation47_spill] sm:$0xff] }
 0x7a9   :  { %2558 = vmatprep.subr.mxu1 %v4907_v18  ;;  %2593 = vmatprep.subr.mxu0 %v4907_v18  ;;  %v299_v34 = vadd.f32 %v2344_v33, %v4912_v35 }
 0x848   :  { %v1756_v9 = vpop.f32.mrf.mxu1  ;;  %v1827_v60 = vpop.f32.mrf.mxu0 }
 0x849   :  { %v1832_v13 = vadd.f32 %v1756_v9, %v4908_v38  ;;  %v1834_v11 = vadd.f32 %v1827_v60, %v4911_v7  ;;  %v2030_v9 = vld [vmem:[%s4660_s4] sm:$0xff]  ;;  %v2073_v60 = vld [vmem:[%s4660_s4 + $0x158] sm:$0xff]  ;;  %v2068_v7 = vld [vmem:[%s4660_s4 + $0x130] sm:$0xff] }
 0x84a   :  { %v1758_v6 = vpop.f32.mrf.mxu1  ;;  %v1829_v45 = vpop.f32.mrf.mxu0  ;;  %v2046_v38 = vld [vmem:[%s4660_s4 + $0x80] sm:$0xff] }
 0x84b   :  { %v2384_v29 = vmul.f32 -1.442695, %v1832_v13  ;;  %v1833_v61 = vadd.f32 %v1758_v6, %v4909_v19  ;;  %v1835_v2 = vadd.f32 %v1829_v45, %v4910_v10  ;;  %v302_v13 = vmax.f32 %v299_v34, 0.0  ;;  %v2077_v6 = vld [vmem:[%s4660_s4 + $0x178] sm:$0xff]  ;;  %v2075_v19 = vld [vmem:[%s4660_s4 + $0x168] sm:$0xff]  ;;  %v2070_v10 = vld [vmem:[%s4660_s4 + $0x140] sm:$0xff] }
 0x84c   :  { %v2071_v45 = vld [vmem:[%s4660_s4 + $0x148] sm:$0xff] }
 0x84d   :  { %2768 = vpow2.f32 %v2384_v29  ;;  %v2385_v15 = vmul.f32 -1.442695, %v1833_v61  ;;  %v2386_v47 = vmul.f32 -1.442695, %v1835_v2  ;;  %v2076_v29 = vld [vmem:[%s4660_s4 + $0x170] sm:$0xff]  ;;  %v2074_v61 = vld [vmem:[%s4660_s4 + $0x160] sm:$0xff] }
 0x84e   :  { %v2069_v2 = vld [vmem:[%s4660_s4 + $0x138] sm:$0xff] }
 0x84f   :  { %2770 = vpow2.f32 %v2385_v15  ;;  %v2072_v15 = vld [vmem:[%s4660_s4 + $0x150] sm:$0xff] }
 0x850   :  { %2772 = vtanh.f32 %v1834_v11  ;;  %v2067_v11 = vld [vmem:[%s4660_s4 + $0x128] sm:$0xff] }
 0x851   :  { %2774 = vpow2.f32 %v2386_v47  ;;  %v2066_v47 = vld [vmem:[%s4660_s4 + $0x120] sm:$0xff] }
 0x85a   :  { %v2769_v50 = vpop.eup %2768 }
 0x85b   :  { %v1839_v52 = vadd.f32 1.0, %v2769_v50  ;;  %v2065_v50 = vld [vmem:[%s4660_s4 + $0x118] sm:$0xff] }
 0x85c   :  { %v2771_v57 = vpop.eup %2770 }
 0x85d   :  { %2776 = vrcp.f32 %v1839_v52  ;;  %v1845_v63 = vadd.f32 1.0, %v2771_v57  ;;  %v2773_v4 = vpop.eup %2772  ;;  %v2064_v52 = vld [vmem:[%s4660_s4 + $0x110] sm:$0xff]  ;;  %v2063_v57 = vld [vmem:[%s4660_s4 + $0x108] sm:$0xff] }
 0x85e   :  { %v2775_v3 = vpop.eup %2774 }
 0x85f   :  { %2778 = vrcp.f32 %v1845_v63  ;;  %v1852_v43 = vadd.f32 1.0, %v2775_v3  ;;  %v2062_v63 = vld [vmem:[%s4660_s4 + $0x100] sm:$0xff] }
 0x860   :  { %v4913_v3 = vld [vmem:[#allocation41_spill] sm:$0xff] }
 0x861   :  { %2780 = vrcp.f32 %v1852_v43  ;;  %v4914_v43 = vld [vmem:[#allocation44_spill] sm:$0xff] }
 0x86a   :  { %v2777_v5 = vpop.eup %2776 }
 0x86b   :  { %v1856_v20 = vmul.f32 %v2777_v5, %v2773_v4 }
 0x86c   :  { %v2779_v27 = vpop.eup %2778 }
 0x86d   :  { %v1855_v12 = vmul.f32 %v2779_v27, %v4363_v39  ;;  %v2039_v39 = vld [vmem:[%s4660_s4 + $0x48] sm:$0xff] }
 0x86e   :  { %v2781_v46 = vpop.eup %2780 }
 0x86f   :  { %v4437_v23 = vadd.f32 %v1856_v20, %v1855_v12 }
 0x871   :  { %2782 = vtanh.f32 %v4437_v23 }
 0x87e   :  { %v2783_v48 = vpop.eup %2782 }
 0x87f   :  { %v1859_v51 = vmul.f32 %v2783_v48, %v2781_v46 }
 0x881   :  { %1925 = vmatmul.mubr.f32.vlgmr.msra.gmra.mxu1 %v1859_v51  ;;  %1996 = vmatmul.mubr.f32.vlgmr.msra.gmra.mxu0 %v1859_v51 }
 0x882   :  { %2559 = vmatpush3.msra.mxu1 %v2045_v56  ;;  %2594 = vmatpush3.msra.mxu0 %v2061_v55  ;;  %v4915_v56 = vld [vmem:[#allocation59_spill] sm:$0xff] }
 0x883   :  { %2560 = vmatprep.subr.mxu1 %v4907_v18  ;;  %2595 = vmatprep.subr.mxu0 %v4907_v18 }
 0x884   :  { %2561 = vmatpush3.msra.mxu1 %v2044_v59  ;;  %2596 = vmatpush3.msra.mxu0 %v2060_v36  ;;  %v4916_v59 = vld [vmem:[#allocation58_spill] sm:$0xff] }
 0x885   :  { %2562 = vmatprep.subr.mxu1 %v4907_v18  ;;  %2597 = vmatprep.subr.mxu0 %v4907_v18 }
 0x886   :  { %2563 = vmatpush3.msra.mxu1 %v2043_v32  ;;  %2598 = vmatpush3.msra.mxu0 %v2059_v8 }
 0x887   :  { %2564 = vmatprep.subr.mxu1 %v4907_v18  ;;  %2599 = vmatprep.subr.mxu0 %v4907_v18 }
 0x888   :  { %2565 = vmatpush3.msra.mxu1 %v2042_v58  ;;  %2600 = vmatpush3.msra.mxu0 %v2058_v31 }
 0x889   :  { %2566 = vmatprep.subr.mxu1 %v4907_v18  ;;  %2601 = vmatprep.subr.mxu0 %v4907_v18 }
 0x88a   :  { %2567 = vmatpush3.msra.mxu1 %v2041_v62  ;;  %2602 = vmatpush3.msra.mxu0 %v2057_v16  ;;  %v2078_v62 = vld [vmem:[%s4660_s4 + $0x180] sm:$0xff]  ;;  %v4917_v16 = vld [vmem:[#allocation20_spill] sm:$0xff]  ;;  %s2913_s4 = smov 116  }
 0x88b   :  { %2568 = vmatprep.subr.mxu1 %v4907_v18  ;;  %2603 = vmatprep.subr.mxu0 %v4907_v18  ;;  %v4920_v34 = vsub.s32 2, %v4917_v16 }
 0x88c   :  { %2569 = vmatpush3.msra.mxu1 %v2040_v14  ;;  %2604 = vmatpush3.msra.mxu0 %v2056_v26  ;;  %v4918_v14 = vsub.s32 0, %v4917_v16 }
 0x88d   :  { %2570 = vmatprep.subr.mxu1 %v4907_v18  ;;  %2605 = vmatprep.subr.mxu0 %v4907_v18 }
 0x88e   :  { %2571 = vmatpush3.msra.mxu1 %v2039_v39  ;;  %2606 = vmatpush3.msra.mxu0 %v2055_v0  ;;  %v2152_v26 = vrot.slane %v2078_v62, %v4918_v14  ;;  %v4919_v39 = vsub.s32 1, %v4917_v16 }
 0x88f   :  { %2572 = vmatprep.subr.mxu1 %v4907_v18  ;;  %2607 = vmatprep.subr.mxu0 %v4907_v18 }
 0x890   :  { %2573 = vmatpush3.msra.mxu1 %v2038_v54  ;;  %2608 = vmatpush3.msra.mxu0 %v2054_v53  ;;  %v2227_v0 = vrot.slane %v2078_v62, %v4919_v39 }
 0x891   :  { %2574 = vmatprep.subr.mxu1 %v4907_v18  ;;  %2609 = vmatprep.subr.mxu0 %v4907_v18 }
 0x892   :  { %2575 = vmatpush3.msra.mxu1 %v2037_v41  ;;  %2610 = vmatpush3.msra.mxu0 %v2053_v17 }
 0x893   :  { %2576 = vmatprep.subr.mxu1 %v4907_v18  ;;  %2611 = vmatprep.subr.mxu0 %v4907_v18 }
 0x894   :  { %2577 = vmatpush3.msra.mxu1 %v2036_v22  ;;  %2612 = vmatpush3.msra.mxu0 %v2052_v40 }
 0x895   :  { %2578 = vmatprep.subr.mxu1 %v4907_v18  ;;  %2613 = vmatprep.subr.mxu0 %v4907_v18 }
 0x896   :  { %2579 = vmatpush3.msra.mxu1 %v2035_v42  ;;  %2614 = vmatpush3.msra.mxu0 %v2051_v21 }
 0x897   :  { %2580 = vmatprep.subr.mxu1 %v4907_v18  ;;  %2615 = vmatprep.subr.mxu0 %v4907_v18 }
 0x898   :  { %2581 = vmatpush3.msra.mxu1 %v2034_v44  ;;  %2616 = vmatpush3.msra.mxu0 %v2050_v25 }
 0x899   :  { %2582 = vmatprep.subr.mxu1 %v4907_v18  ;;  %2617 = vmatprep.subr.mxu0 %v4907_v18 }
 0x89a   :  { %2583 = vmatpush3.msra.mxu1 %v2033_v28  ;;  %2618 = vmatpush3.msra.mxu0 %v2049_v30 }
 0x89b   :  { %2584 = vmatprep.subr.mxu1 %v4907_v18  ;;  %2619 = vmatprep.subr.mxu0 %v4907_v18 }
 0x89c   :  { %2585 = vmatpush3.msra.mxu1 %v2032_v49  ;;  %2620 = vmatpush3.msra.mxu0 %v2048_v24 }
 0x89d   :  { %2586 = vmatprep.subr.mxu1 %v4907_v18  ;;  %2621 = vmatprep.subr.mxu0 %v4907_v18 }
 0x89e   :  { %2587 = vmatpush3.msra.mxu1 %v2031_v37  ;;  %2622 = vmatpush3.msra.mxu0 %v2047_v1 }
 0x89f   :  { %2588 = vmatprep.subr.mxu1 %v4907_v18  ;;  %2623 = vmatprep.subr.mxu0 %v4907_v18 }
 0x8a0   :  { %2589 = vmatpush3.msra.mxu1 %v2030_v9  ;;  %2590 = vmatprep.mubr.msk.f32.mxu1 %vm2912_vm0, %v4907_v18  ;;  %v2302_v9 = vrot.slane %v2078_v62, %v4920_v34 }
 0x8a1   :  { %2624 = vmatpush3.msra.mxu0 %v2046_v38  ;;  %2625 = vmatprep.mubr.msk.f32.mxu0 %vm2912_vm0, %v4907_v18 }
 0x8a2   :  { %2591 = vmatmul.mubr.f32.vlgmr.msra.gmra.mxu1 %v302_v13  ;;  %2626 = vmatmul.mubr.f32.vlgmr.msra.gmra.mxu0 %v302_v13 }
 0x8a3   :  { %2628 = vmatprep.subr.mxu1 %v4907_v18  ;;  %2660 = vmatprep.mubr.msk.f32.mxu1 %vm2912_vm0, %v4907_v18 }
 0x8a4   :  { %2629 = vmatpush3.msra.mxu1 %v2077_v6 }
 0x8a5   :  { %2630 = vmatprep.subr.mxu1 %v4907_v18 }
 0x8a6   :  { %2631 = vmatpush3.msra.mxu1 %v2076_v29 }
 0x8a7   :  { %2632 = vmatprep.subr.mxu1 %v4907_v18 }
 0x8a8   :  { %2633 = vmatpush3.msra.mxu1 %v2075_v19 }
 0x8a9   :  { %2634 = vmatprep.subr.mxu1 %v4907_v18 }
 0x8aa   :  { %2635 = vmatpush3.msra.mxu1 %v2074_v61 }
 0x8ab   :  { %2636 = vmatprep.subr.mxu1 %v4907_v18 }
 0x8ac   :  { %2637 = vmatpush3.msra.mxu1 %v2073_v60  ;;  %v4921_v60 = vsub.s32 3, %v4917_v16 }
 0x8ad   :  { %2638 = vmatprep.subr.mxu1 %v4907_v18 }
 0x8ae   :  { %2639 = vmatpush3.msra.mxu1 %v2072_v15  ;;  %v2322_v15 = vrot.slane %v2078_v62, %v4921_v60 }
 0x8af   :  { %2640 = vmatprep.subr.mxu1 %v4907_v18 }
 0x8b0   :  { %2641 = vmatpush3.msra.mxu1 %v2071_v45 }
 0x8b1   :  { %2642 = vmatprep.subr.mxu1 %v4907_v18 }
 0x8b2   :  { %2643 = vmatpush3.msra.mxu1 %v2070_v10 }
 0x8b3   :  { %2644 = vmatprep.subr.mxu1 %v4907_v18 }
 0x8b4   :  { %2645 = vmatpush3.msra.mxu1 %v2069_v2 }
 0x8b5   :  { %2646 = vmatprep.subr.mxu1 %v4907_v18 }
 0x8b6   :  { %2647 = vmatpush3.msra.mxu1 %v2068_v7 }
 0x8b7   :  { %2648 = vmatprep.subr.mxu1 %v4907_v18 }
 0x8b8   :  { %2649 = vmatpush3.msra.mxu1 %v2067_v11 }
 0x8b9   :  { %2650 = vmatprep.subr.mxu1 %v4907_v18 }
 0x8ba   :  { %2651 = vmatpush3.msra.mxu1 %v2066_v47 }
 0x8bb   :  { %2652 = vmatprep.subr.mxu1 %v4907_v18 }
 0x8bc   :  { %2653 = vmatpush3.msra.mxu1 %v2065_v50 }
 0x8bd   :  { %2654 = vmatprep.subr.mxu1 %v4907_v18 }
 0x8be   :  { %2655 = vmatpush3.msra.mxu1 %v2064_v52 }
 0x8bf   :  { %2656 = vmatprep.subr.mxu1 %v4907_v18 }
 0x8c0   :  { %2657 = vmatpush3.msra.mxu1 %v2063_v57 }
 0x8c1   :  { %2658 = vmatprep.subr.mxu1 %v4907_v18 }
 0x8c2   :  { %2659 = vmatpush3.msra.mxu1 %v2062_v63 }
 0x941   :  { %v1926_v4 = vpop.f32.mrf.mxu1  ;;  %v1997_v46 = vpop.f32.mrf.mxu0 }
 0x942   :  { %v2002_v5 = vadd.f32 %v1926_v4, %v4913_v3  ;;  %v2004_v36 = vadd.f32 %v1997_v46, %v4916_v59 }
 0x943   :  { %v1928_v20 = vpop.f32.mrf.mxu1  ;;  %v1999_v51 = vpop.f32.mrf.mxu0 }
 0x944   :  { %v2387_v27 = vmul.f32 -1.442695, %v2002_v5  ;;  %v2003_v12 = vadd.f32 %v1928_v20, %v4914_v43  ;;  %v2005_v55 = vadd.f32 %v1999_v51, %v4915_v56 }
 0x946   :  { %2784 = vpow2.f32 %v2387_v27  ;;  %v2388_v48 = vmul.f32 -1.442695, %v2003_v12  ;;  %v2389_v32 = vmul.f32 -1.442695, %v2005_v55 }
 0x948   :  { %2786 = vpow2.f32 %v2388_v48 }
 0x949   :  { %2788 = vtanh.f32 %v2004_v36 }
 0x94a   :  { %2790 = vpow2.f32 %v2389_v32 }
 0x953   :  { %v2785_v8 = vpop.eup %2784 }
 0x954   :  { %v2009_v18 = vadd.f32 1.0, %v2785_v8 }
 0x955   :  { %v2787_v58 = vpop.eup %2786 }
 0x956   :  { %2792 = vrcp.f32 %v2009_v18  ;;  %v2015_v31 = vadd.f32 1.0, %v2787_v58  ;;  %v2789_v54 = vpop.eup %2788 }
 0x957   :  { %v2791_v53 = vpop.eup %2790 }
 0x958   :  { %2794 = vrcp.f32 %v2015_v31  ;;  %v2022_v30 = vadd.f32 1.0, %v2791_v53 }
 0x95a   :  { %2796 = vrcp.f32 %v2022_v30 }
 0x962   :  { %v2145_v41 = vpop.f32.mrf.mxu1  ;;  %v2220_v17 = vpop.f32.mrf.mxu0 }
 0x963   :  { %v2793_v22 = vpop.eup %2792  ;;  %v2153_v40 = vadd.f32 %v2152_v26, %v2145_v41  ;;  %v2228_v42 = vadd.f32 %v2227_v0, %v2220_v17 }
 0x964   :  { %v2026_v21 = vmul.f32 %v2793_v22, %v2789_v54  ;;  %v2592_v44 = vpop.f32.mrf.mxu1  ;;  %v2627_v25 = vpop.f32.mrf.mxu0 }
 0x965   :  { %v2795_v28 = vpop.eup %2794  ;;  %v2304_v33 = vmul.f32 %v2228_v42, %v2153_v40 }
 0x966   :  { %v2025_v49 = vmul.f32 %v2795_v28, %v4437_v23 }
 0x967   :  { %v2797_v37 = vpop.eup %2796 }
 0x968   :  { %v2027_v24 = vadd.f32 %v2026_v21, %v2025_v49 }
 0x96a   :  { %2798 = vtanh.f32 %v2027_v24 }
 0x977   :  { %v2799_v1 = vpop.eup %2798 }
 0x978   :  { %v2029_v35 = vmul.f32 %v2799_v1, %v2797_v37 }
 0x97a   :  { %2661 = vmatmul.mubr.f32.vlgmr.msra.gmra.mxu1 %v2029_v35 }
 0xa3a   :  { %v2295_v38 = vpop.f32.mrf.mxu1 }
 0xa3b   :  { %v2303_v13 = vadd.f32 %v2302_v9, %v2295_v38 }
 0xa3c   :  { %v2662_v6 = vpop.f32.mrf.mxu1 }
 0xa3d   :  { %v2305_v29 = vmul.f32 %v2304_v33, %v2303_v13 }
 0xa3f   :  { %2315 = vrot.lane.b32.xlu1 %v2305_v29, %s2913_s4  ;;  %2307 = vrot.lane.b32.xlu0 %v2305_v29, %s2914_s22 }
 0xa43   :  { %2311 = vrot.lane.b32.xlu0 %v2305_v29, %s2915_s23 }
 0xab1   :  { %v2308_v23 = vpop.permute.xlu0 %2307  ;;  %v2316_v10 = vpop.permute.xlu1 %2315 }
 0xab2   :  { %v2310_v19 = vadd.f32 %v2308_v23, %v2305_v29 }
 0xab5   :  { %v2312_v61 = vpop.permute.xlu0 %2311 }
 0xab6   :  { %v2314_v45 = vadd.f32 %v2312_v61, %v2310_v19 }
 0xab8   :  { %v2318_v2 = vadd.f32 %v2316_v10, %v2314_v45 }
 0xaba   :  { %v2323_v7 = vadd.f32 %v2322_v15, %v2318_v2 }
 0xabc   :  { %2325 = vst.msk [vmem:[#allocation5] sm:$0xf] %vm2324_vm4, %v2323_v7 }
 0xabd   :  { %2895 = shalt.err (!%p2892_p9)
}
 0xabe   :  { %2335 = dma.vmem_to_hbm [thread:$0]  %s2333_s2, 64, %s4661_s5, [#allocation4]  }
 0xabf   :  { %2906 = dma.done.wait [#allocation4], 64  }
 0xac0   :  { %2907 = vsyncadd [#allocation4], 4294967232 }
 0xac1   :  { %2339 = vsyncpa [#allocation3], 1 }
 0xac2   :  { %2340 = vsyncpa [#allocation4], 1 }

</bundles_post_ra>
